<compile_context>
chip_gen: v7x
topology: tpu7x:2x2x1
jax: 0.10.0
libtpu: 0.0.40
codegen_flags: <defaults>
</compile_context>

<pallas_src>
import functools

import numpy as np
import jax
import jax.numpy as jnp
from jax.experimental import pallas as pl
from jax.experimental.pallas import tpu as pltpu


def _conv_prelu_kernel(x_ref, w_ref, b_ref, a_ref, o_ref, *, kh, th, w_tile, cout8):
    # x_ref: (1, 1, th+kh-1, w_tile, KW*CIN_PAD)  bf16   KW-pre-expanded halo slab
    # w_ref: (K2C, COUT_PAD)                      bf16   im2col weight (i, j, c) order
    # b_ref: (1, COUT_PAD)                        f32    bias (zero-padded lanes)
    # a_ref: (1, COUT_PAD)                        f32    PReLU slope
    # o_ref: (1, th, w_tile, cout8)               f32
    slab = x_ref[0, 0]                                   # (th+kh-1, w_tile, kwc)
    taps = [slab[i:i + th] for i in range(kh)]           # kh pure H-offset views
    patches = jnp.concatenate(taps, axis=-1)             # (th, w_tile, K2C) bf16
    patches = patches.reshape(th * w_tile, -1)           # (M, K2C)

    # Single MXU dot, f32 accumulation, fused bias + PReLU epilogue in f32.
    acc = jnp.dot(patches, w_ref[...], preferred_element_type=jnp.float32)
    acc = acc + b_ref[...]
    out = jnp.where(acc >= 0.0, acc, a_ref[...] * acc)   # (M, COUT_PAD) f32
    out = out[:, :cout8].reshape(th, w_tile, cout8)      # tight channel pad only
    o_ref[0] = out.astype(o_ref.dtype)


def _round_up(x, m):
    return ((x + m - 1) // m) * m


def _vmem_budget_bytes():
    try:
        cap = int(pltpu.get_tpu_info().vmem_capacity_bytes)
    except Exception:
        cap = 64 * 2**20  # conservative fallback (v7x per-TC physical VMEM)
    return int(0.75 * cap)


def _pick_tiles(ho, wo, kh, kwc, k2c, cout_pad, cout8, budget):
    # W (output-column) tile: full width when small, else 256-column tiles.
    if wo <= 512:
        w_tile = _round_up(wo, 8)
    else:
        w_tile = 256
    wo_pad = _round_up(wo, w_tile)

    # Row tile: largest multiple of 8 whose per-step working set fits the budget.
    th_cap = min(_round_up(ho, 8), 256)
    th = 8
    for cand in range(8, th_cap + 1, 8):
        m = cand * w_tile
        slab_b = 2 * (cand + kh - 1) * w_tile * kwc * 2   # double-buffered bf16 slab
        out_b = 2 * cand * w_tile * cout8 * 4             # double-buffered f32 out
        wgt_b = 2 * k2c * cout_pad * 2                    # weight (worst case 2 bufs)
        patches_b = 2 * m * k2c * 2                       # taps + concat copies
        acc_b = 2 * m * cout_pad * 4                      # acc + epilogue temps
        total = slab_b + out_b + wgt_b + patches_b + acc_b
        if total <= 0.6 * budget and m <= 4096:
            th = cand
    return th, w_tile, wo_pad


def conv_prelu(x_nchw, weight_oihw, bias, alpha, *, stride=1, padding=2):
    """Conv2d(kernel=5, stride=1, padding=2) followed by PReLU (NCHW f32 out)."""
    # TODO(synk): stride != 1 not implemented (module's forward uses the default stride=1).
    assert stride == 1
    N, Cin, H, W = x_nchw.shape
    Cout, Cin_w, KH, KW = weight_oihw.shape
    assert Cin == Cin_w

    Ho = H + 2 * padding - KH + 1
    Wo = W + 2 * padding - KW + 1

    CIN_PAD = _round_up(Cin, 8)
    COUT_PAD = _round_up(Cout, 128)       # lane-dense MXU output columns
    COUT8 = _round_up(Cout, 8)            # tight channel pad for the f32 writeback
    KWC = KW * CIN_PAD
    K2C = KH * KWC

    budget = _vmem_budget_bytes()
    TH, W_TILE, Wo_pad = _pick_tiles(Ho, Wo, KH, KWC, K2C, COUT_PAD, COUT8, budget)
    Ho_pad = _round_up(Ho, TH)
    num_r = Ho_pad // TH
    num_w = Wo_pad // W_TILE
    Hp_pad = Ho_pad + KH - 1
    Wp_pad = Wo_pad + KW - 1
    SLAB = TH + KH - 1

    # ---- data-layout glue (XLA, done once) ---------------------------------
    x = jnp.transpose(x_nchw, (0, 2, 3, 1)).astype(jnp.bfloat16)           # NHWC bf16
    xp = jnp.pad(
        x,
        ((0, 0),
         (padding, Hp_pad - H - padding),
         (padding, Wp_pad - W - padding),
         (0, CIN_PAD - Cin)))                                              # (N,Hp_pad,Wp_pad,CIN_PAD)

    # Partial im2col over W only (KW pre-expansion): lanes become (kw, cin).
    x_kw = jnp.concatenate([xp[:, :, j:j + Wo_pad, :] for j in range(KW)],
                           axis=-1)                                        # (N,Hp_pad,Wo_pad,KWC)

    # Overlapping row slabs so each grid step only needs a (TH+KH-1)-row halo.
    row_idx = (np.arange(num_r)[:, None] * TH
               + np.arange(SLAB)[None, :])                                 # (num_r, SLAB)
    x_slabs = x_kw[:, row_idx, :, :]                                       # (N,num_r,SLAB,Wo_pad,KWC)

    w4 = jnp.transpose(weight_oihw, (2, 3, 1, 0))                          # (KH,KW,Cin,Cout)
    w4 = jnp.pad(w4, ((0, 0), (0, 0), (0, CIN_PAD - Cin), (0, COUT_PAD - Cout)))
    w2 = w4.reshape(K2C, COUT_PAD).astype(jnp.bfloat16)

    b2 = jnp.zeros((1, COUT_PAD), jnp.float32).at[0, :Cout].set(
        jnp.asarray(bias, jnp.float32))
    alpha_vec = jnp.asarray(alpha, jnp.float32).reshape(-1)
    if alpha_vec.size == 1:
        alpha_vec = jnp.broadcast_to(alpha_vec, (Cout,))
    a2 = jnp.zeros((1, COUT_PAD), jnp.float32).at[0, :Cout].set(alpha_vec)

    cost = pl.CostEstimate(
        flops=2 * N * Ho_pad * Wo_pad * K2C * COUT_PAD,
        transcendentals=0,
        bytes_accessed=int(x_slabs.size * 2 + w2.size * 2 + b2.size * 4
                           + a2.size * 4 + N * Ho_pad * Wo_pad * COUT8 * 4),
    )

    kernel = functools.partial(_conv_prelu_kernel, kh=KH, th=TH,
                               w_tile=W_TILE, cout8=COUT8)

    def build(single_buffer_consts):
        cmode = {"pipeline_mode": pl.Buffered(1)} if single_buffer_consts else {}
        in_specs = [
            pl.BlockSpec((1, 1, SLAB, W_TILE, KWC),
                         lambda n, r, c: (n, r, 0, c, 0)),                  # halo slab
            pl.BlockSpec((K2C, COUT_PAD), lambda n, r, c: (0, 0), **cmode), # weight
            pl.BlockSpec((1, COUT_PAD), lambda n, r, c: (0, 0), **cmode),   # bias
            pl.BlockSpec((1, COUT_PAD), lambda n, r, c: (0, 0), **cmode),   # alpha
        ]
        return pl.pallas_call(
            kernel,
            out_shape=jax.ShapeDtypeStruct((N, Ho_pad, Wo_pad, COUT8), jnp.float32),
            grid=(N, num_r, num_w),
            in_specs=in_specs,
            out_specs=pl.BlockSpec((1, TH, W_TILE, COUT8),
                                   lambda n, r, c: (n, r, c, 0)),
            compiler_params=pltpu.CompilerParams(
                dimension_semantics=("parallel", "parallel", "parallel"),
                vmem_limit_bytes=budget,
            ),
            cost_estimate=cost,
        )

    try:
        out_nhwc = jax.block_until_ready(build(True)(x_slabs, w2, b2, a2))
    except Exception:
        # Fallback if single-buffered invariant operands (pl.Buffered(1)) are
        # not supported by this JAX version.
        out_nhwc = build(False)(x_slabs, w2, b2, a2)

    out = out_nhwc[:, :Ho, :Wo, :Cout]                   # drop row/col/channel padding
    return jnp.transpose(out, (0, 3, 1, 2))              # NCHW f32


if __name__ == "__main__":
    key = jax.random.PRNGKey(0)
    k1, k2, k3 = jax.random.split(key, 3)

    # Small shapes consistent with the module's forward (NCHW input).
    N, Cin, Cout, H, W, K = 2, 4, 8, 16, 16, 5
    x = jax.random.normal(k1, (N, Cin, H, W), jnp.float32)
    weight = jax.random.normal(k2, (Cout, Cin, K, K), jnp.float32) * 0.1
    bias = jax.random.normal(k3, (Cout,), jnp.float32) * 0.1
    alpha = jnp.full((1,), 0.25, jnp.float32)            # nn.PReLU() default: 1 param, 0.25

    out = conv_prelu(x, weight, bias, alpha)
    out = jax.block_until_ready(out)
    assert out.shape == (N, Cout, H, W)

    # Reference with the same bf16-operand / f32-accumulation numerics.
    ref = jax.lax.conv_general_dilated(
        x.astype(jnp.bfloat16), weight.astype(jnp.bfloat16),
        window_strides=(1, 1), padding=((2, 2), (2, 2)),
        dimension_numbers=("NCHW", "OIHW", "NCHW"),
        preferred_element_type=jnp.float32,
    ) + bias.reshape(1, Cout, 1, 1)
    alpha_bc = jnp.broadcast_to(jnp.asarray(alpha, jnp.float32).reshape(-1), (Cout,))
    ref = jnp.where(ref >= 0.0, ref, alpha_bc.reshape(1, Cout, 1, 1) * ref)
    np.testing.assert_allclose(np.asarray(out), np.asarray(ref), rtol=2e-2, atol=2e-3)

    print("KERNEL_OK")
</pallas_src>

<mosaic_0001>
module attributes {stable_mosaic.version = 11 : i64} {
  func.func @_conv_prelu_kernel(%arg0: i32, %arg1: i32, %arg2: i32, %arg3: memref<1x1x20x16x40xbf16, #tpu.memory_space<vmem>>, %arg4: memref<200x128xbf16, #tpu.memory_space<vmem>>, %arg5: memref<1x128xf32, #tpu.memory_space<vmem>>, %arg6: memref<1x128xf32, #tpu.memory_space<vmem>>, %arg7: memref<1x16x16x8xf32, #tpu.memory_space<vmem>>) attributes {dimension_semantics = [#tpu.dimension_semantics<parallel>, #tpu.dimension_semantics<parallel>, #tpu.dimension_semantics<parallel>], iteration_bounds = array<i64: 2, 1, 1>, scalar_prefetch = 0 : i64, scratch_operands = 0 : i64, tpu.core_type = #tpu.core_type<tc>, window_params = [{transform_indices = @transform_0, window_bounds = array<i64: 1, 1, 20, 16, 40>}, {pipeline_mode = #tpu.pipeline_mode<synchronous>, transform_indices = @transform_1, window_bounds = array<i64: 200, 128>}, {pipeline_mode = #tpu.pipeline_mode<synchronous>, transform_indices = @transform_2, window_bounds = array<i64: 1, 128>}, {pipeline_mode = #tpu.pipeline_mode<synchronous>, transform_indices = @transform_3, window_bounds = array<i64: 1, 128>}, {transform_indices = @transform_4, window_bounds = array<i64: 1, 16, 16, 8>}]} {
    %c0 = arith.constant 0 : index
    %c0_0 = arith.constant 0 : index
    %c0_1 = arith.constant 0 : index
    %c0_2 = arith.constant 0 : index
    %c0_3 = arith.constant 0 : index
    %0 = vector.load %arg3[%c0, %c0_0, %c0_1, %c0_2, %c0_3] : memref<1x1x20x16x40xbf16, #tpu.memory_space<vmem>>, vector<1x1x20x16x40xbf16>
    %1 = vector.shape_cast %0 : vector<1x1x20x16x40xbf16> to vector<20x16x40xbf16>
    %2 = vector.extract_strided_slice %1 {offsets = [0, 0, 0], sizes = [16, 16, 40], strides = [1, 1, 1]} : vector<20x16x40xbf16> to vector<16x16x40xbf16>
    %3 = vector.extract_strided_slice %1 {offsets = [1, 0, 0], sizes = [16, 16, 40], strides = [1, 1, 1]} : vector<20x16x40xbf16> to vector<16x16x40xbf16>
    %4 = vector.extract_strided_slice %1 {offsets = [2, 0, 0], sizes = [16, 16, 40], strides = [1, 1, 1]} : vector<20x16x40xbf16> to vector<16x16x40xbf16>
    %5 = vector.extract_strided_slice %1 {offsets = [3, 0, 0], sizes = [16, 16, 40], strides = [1, 1, 1]} : vector<20x16x40xbf16> to vector<16x16x40xbf16>
    %6 = vector.extract_strided_slice %1 {offsets = [4, 0, 0], sizes = [16, 16, 40], strides = [1, 1, 1]} : vector<20x16x40xbf16> to vector<16x16x40xbf16>
    %7 = tpu.concatenate %2, %3, %4, %5, %6 in 2 : vector<16x16x40xbf16>, vector<16x16x40xbf16>, vector<16x16x40xbf16>, vector<16x16x40xbf16>, vector<16x16x40xbf16> -> vector<16x16x200xbf16>
    %8 = vector.shape_cast %7 : vector<16x16x200xbf16> to vector<256x200xbf16>
    %c0_4 = arith.constant 0 : index
    %c0_5 = arith.constant 0 : index
    %9 = vector.load %arg4[%c0_4, %c0_5] : memref<200x128xbf16, #tpu.memory_space<vmem>>, vector<200x128xbf16>
    %cst = arith.constant dense<0.000000e+00> : vector<256x128xf32>
    %10 = tpu.matmul %8, %9, %cst {dimension_numbers = #tpu.dot_dimension_numbers<[1], [0], [0], [1], [0, 0, 1, 1], [], []>} : vector<256x200xbf16>, vector<200x128xbf16>, vector<256x128xf32> -> vector<256x128xf32>
    %c0_6 = arith.constant 0 : index
    %c0_7 = arith.constant 0 : index
    %11 = vector.load %arg5[%c0_6, %c0_7] : memref<1x128xf32, #tpu.memory_space<vmem>>, vector<1x128xf32>
    %12 = vector.broadcast %11 : vector<1x128xf32> to vector<256x128xf32>
    %13 = arith.addf %10, %12 : vector<256x128xf32>
    %cst_8 = arith.constant 0.000000e+00 : f32
    %14 = vector.broadcast %cst_8 : f32 to vector<256x128xf32>
    %15 = arith.cmpf oge, %13, %14 : vector<256x128xf32>
    %c0_9 = arith.constant 0 : index
    %c0_10 = arith.constant 0 : index
    %16 = vector.load %arg6[%c0_9, %c0_10] : memref<1x128xf32, #tpu.memory_space<vmem>>, vector<1x128xf32>
    %17 = vector.broadcast %16 : vector<1x128xf32> to vector<256x128xf32>
    %18 = arith.mulf %17, %13 : vector<256x128xf32>
    %19 = arith.select %15, %13, %18 : vector<256x128xi1>, vector<256x128xf32>
    %20 = vector.extract_strided_slice %19 {offsets = [0, 0], sizes = [256, 8], strides = [1, 1]} : vector<256x128xf32> to vector<256x8xf32>
    %21 = vector.shape_cast %20 : vector<256x8xf32> to vector<16x16x8xf32>
    %c0_11 = arith.constant 0 : index
    %c0_12 = arith.constant 0 : index
    %c0_13 = arith.constant 0 : index
    %c0_14 = arith.constant 0 : index
    %22 = vector.load %arg7[%c0_11, %c0_12, %c0_13, %c0_14] : memref<1x16x16x8xf32, #tpu.memory_space<vmem>>, vector<1x16x16x8xf32>
    %23 = vector.shape_cast %22 : vector<1x16x16x8xf32> to vector<16x16x8xf32>
    %24 = vector.shape_cast %21 : vector<16x16x8xf32> to vector<1x16x16x8xf32>
    tpu.vector_store %arg7[%c0_11, %c0_12, %c0_13, %c0_14], %24 {strides = array<i32>} : memref<1x16x16x8xf32, #tpu.memory_space<vmem>>, vector<1x16x16x8xf32>,
    return
  }
  func.func @transform_0(%arg0: i32, %arg1: i32, %arg2: i32) -> (i32, i32, i32, i32, i32) {
    %c0_i32 = arith.constant 0 : i32
    %c0_i32_0 = arith.constant 0 : i32
    %c0_i32_1 = arith.constant 0 : i32
    return %arg0, %arg1, %c0_i32, %arg2, %c0_i32_0 : i32, i32, i32, i32, i32
  }
  func.func @transform_1(%arg0: i32, %arg1: i32, %arg2: i32) -> (i32, i32) {
    %c0_i32 = arith.constant 0 : i32
    %c0_i32_0 = arith.constant 0 : i32
    %c0_i32_1 = arith.constant 0 : i32
    return %c0_i32, %c0_i32_0 : i32, i32
  }
  func.func @transform_2(%arg0: i32, %arg1: i32, %arg2: i32) -> (i32, i32) {
    %c0_i32 = arith.constant 0 : i32
    %c0_i32_0 = arith.constant 0 : i32
    %c0_i32_1 = arith.constant 0 : i32
    return %c0_i32, %c0_i32_0 : i32, i32
  }
  func.func @transform_3(%arg0: i32, %arg1: i32, %arg2: i32) -> (i32, i32) {
    %c0_i32 = arith.constant 0 : i32
    %c0_i32_0 = arith.constant 0 : i32
    %c0_i32_1 = arith.constant 0 : i32
    return %c0_i32, %c0_i32_0 : i32, i32
  }
  func.func @transform_4(%arg0: i32, %arg1: i32, %arg2: i32) -> (i32, i32, i32, i32) {
    %c0_i32 = arith.constant 0 : i32
    %c0_i32_0 = arith.constant 0 : i32
    return %arg0, %arg1, %arg2, %c0_i32 : i32, i32, i32, i32
  }
}

module attributes {stable_mosaic.version = 11 : i64} {
  func.func @_conv_prelu_kernel(%arg0: i32, %arg1: i32, %arg2: i32, %arg3: memref<1x1x20x16x40xbf16, #tpu.memory_space<vmem>>, %arg4: memref<200x128xbf16, #tpu.memory_space<vmem>>, %arg5: memref<1x128xf32, #tpu.memory_space<vmem>>, %arg6: memref<1x128xf32, #tpu.memory_space<vmem>>, %arg7: memref<1x16x16x8xf32, #tpu.memory_space<vmem>>) attributes {dimension_semantics = [#tpu.dimension_semantics<parallel>, #tpu.dimension_semantics<parallel>, #tpu.dimension_semantics<parallel>], iteration_bounds = array<i64: 2, 1, 1>, scalar_prefetch = 0 : i64, scratch_operands = 0 : i64, tpu.core_type = #tpu.core_type<tc>, window_params = [{transform_indices = @transform_0, window_bounds = array<i64: 1, 1, 20, 16, 40>}, {pipeline_mode = #tpu.pipeline_mode<synchronous>, transform_indices = @transform_1, window_bounds = array<i64: 200, 128>}, {pipeline_mode = #tpu.pipeline_mode<synchronous>, transform_indices = @transform_2, window_bounds = array<i64: 1, 128>}, {pipeline_mode = #tpu.pipeline_mode<synchronous>, transform_indices = @transform_3, window_bounds = array<i64: 1, 128>}, {transform_indices = @transform_4, window_bounds = array<i64: 1, 16, 16, 8>}]} {
    %c0 = arith.constant 0 : index
    %c0_0 = arith.constant 0 : index
    %c0_1 = arith.constant 0 : index
    %c0_2 = arith.constant 0 : index
    %c0_3 = arith.constant 0 : index
    %0 = vector.load %arg3[%c0, %c0_0, %c0_1, %c0_2, %c0_3] : memref<1x1x20x16x40xbf16, #tpu.memory_space<vmem>>, vector<1x1x20x16x40xbf16>
    %1 = vector.shape_cast %0 : vector<1x1x20x16x40xbf16> to vector<20x16x40xbf16>
    %2 = vector.extract_strided_slice %1 {offsets = [0, 0, 0], sizes = [16, 16, 40], strides = [1, 1, 1]} : vector<20x16x40xbf16> to vector<16x16x40xbf16>
    %3 = vector.extract_strided_slice %1 {offsets = [1, 0, 0], sizes = [16, 16, 40], strides = [1, 1, 1]} : vector<20x16x40xbf16> to vector<16x16x40xbf16>
    %4 = vector.extract_strided_slice %1 {offsets = [2, 0, 0], sizes = [16, 16, 40], strides = [1, 1, 1]} : vector<20x16x40xbf16> to vector<16x16x40xbf16>
    %5 = vector.extract_strided_slice %1 {offsets = [3, 0, 0], sizes = [16, 16, 40], strides = [1, 1, 1]} : vector<20x16x40xbf16> to vector<16x16x40xbf16>
    %6 = vector.extract_strided_slice %1 {offsets = [4, 0, 0], sizes = [16, 16, 40], strides = [1, 1, 1]} : vector<20x16x40xbf16> to vector<16x16x40xbf16>
    %7 = tpu.concatenate %2, %3, %4, %5, %6 in 2 : vector<16x16x40xbf16>, vector<16x16x40xbf16>, vector<16x16x40xbf16>, vector<16x16x40xbf16>, vector<16x16x40xbf16> -> vector<16x16x200xbf16>
    %8 = vector.shape_cast %7 : vector<16x16x200xbf16> to vector<256x200xbf16>
    %c0_4 = arith.constant 0 : index
    %c0_5 = arith.constant 0 : index
    %9 = vector.load %arg4[%c0_4, %c0_5] : memref<200x128xbf16, #tpu.memory_space<vmem>>, vector<200x128xbf16>
    %cst = arith.constant dense<0.000000e+00> : vector<256x128xf32>
    %10 = tpu.matmul %8, %9, %cst {dimension_numbers = #tpu.dot_dimension_numbers<[1], [0], [0], [1], [0, 0, 1, 1], [], []>} : vector<256x200xbf16>, vector<200x128xbf16>, vector<256x128xf32> -> vector<256x128xf32>
    %c0_6 = arith.constant 0 : index
    %c0_7 = arith.constant 0 : index
    %11 = vector.load %arg5[%c0_6, %c0_7] : memref<1x128xf32, #tpu.memory_space<vmem>>, vector<1x128xf32>
    %12 = vector.broadcast %11 : vector<1x128xf32> to vector<256x128xf32>
    %13 = arith.addf %10, %12 : vector<256x128xf32>
    %cst_8 = arith.constant 0.000000e+00 : f32
    %14 = vector.broadcast %cst_8 : f32 to vector<256x128xf32>
    %15 = arith.cmpf oge, %13, %14 : vector<256x128xf32>
    %c0_9 = arith.constant 0 : index
    %c0_10 = arith.constant 0 : index
    %16 = vector.load %arg6[%c0_9, %c0_10] : memref<1x128xf32, #tpu.memory_space<vmem>>, vector<1x128xf32>
    %17 = vector.broadcast %16 : vector<1x128xf32> to vector<256x128xf32>
    %18 = arith.mulf %17, %13 : vector<256x128xf32>
    %19 = arith.select %15, %13, %18 : vector<256x128xi1>, vector<256x128xf32>
    %20 = vector.extract_strided_slice %19 {offsets = [0, 0], sizes = [256, 8], strides = [1, 1]} : vector<256x128xf32> to vector<256x8xf32>
    %21 = vector.shape_cast %20 : vector<256x8xf32> to vector<16x16x8xf32>
    %c0_11 = arith.constant 0 : index
    %c0_12 = arith.constant 0 : index
    %c0_13 = arith.constant 0 : index
    %c0_14 = arith.constant 0 : index
    %22 = vector.load %arg7[%c0_11, %c0_12, %c0_13, %c0_14] : memref<1x16x16x8xf32, #tpu.memory_space<vmem>>, vector<1x16x16x8xf32>
    %23 = vector.shape_cast %22 : vector<1x16x16x8xf32> to vector<16x16x8xf32>
    %24 = vector.shape_cast %21 : vector<16x16x8xf32> to vector<1x16x16x8xf32>
    tpu.vector_store %arg7[%c0_11, %c0_12, %c0_13, %c0_14], %24 {strides = array<i32>} : memref<1x16x16x8xf32, #tpu.memory_space<vmem>>, vector<1x16x16x8xf32>,
    return
  }
  func.func @transform_0(%arg0: i32, %arg1: i32, %arg2: i32) -> (i32, i32, i32, i32, i32) {
    %c0_i32 = arith.constant 0 : i32
    %c0_i32_0 = arith.constant 0 : i32
    %c0_i32_1 = arith.constant 0 : i32
    return %arg0, %arg1, %c0_i32, %arg2, %c0_i32_0 : i32, i32, i32, i32, i32
  }
  func.func @transform_1(%arg0: i32, %arg1: i32, %arg2: i32) -> (i32, i32) {
    %c0_i32 = arith.constant 0 : i32
    %c0_i32_0 = arith.constant 0 : i32
    %c0_i32_1 = arith.constant 0 : i32
    return %c0_i32, %c0_i32_0 : i32, i32
  }
  func.func @transform_2(%arg0: i32, %arg1: i32, %arg2: i32) -> (i32, i32) {
    %c0_i32 = arith.constant 0 : i32
    %c0_i32_0 = arith.constant 0 : i32
    %c0_i32_1 = arith.constant 0 : i32
    return %c0_i32, %c0_i32_0 : i32, i32
  }
  func.func @transform_3(%arg0: i32, %arg1: i32, %arg2: i32) -> (i32, i32) {
    %c0_i32 = arith.constant 0 : i32
    %c0_i32_0 = arith.constant 0 : i32
    %c0_i32_1 = arith.constant 0 : i32
    return %c0_i32, %c0_i32_0 : i32, i32
  }
  func.func @transform_4(%arg0: i32, %arg1: i32, %arg2: i32) -> (i32, i32, i32, i32) {
    %c0_i32 = arith.constant 0 : i32
    %c0_i32_0 = arith.constant 0 : i32
    return %arg0, %arg1, %arg2, %c0_i32 : i32, i32, i32, i32
  }
}

</mosaic_0001>

<bundles_post_ra>
// kernel: tpu_custom_call.1
= control target key start
LH: loop header
LB: loop body
LE: loop exit
PB: predicated region body
PF: predicated region fallthrough
CT: control target
= control target key end

     0   :  { %9 = vsyncpa [#allocation3], 0  ;;  %s2223_s0 = inlined_call_operand.hbm [shape: bf16[2,1,20,16,40], index: 0, kind: input, shape index: {}]   ;;  %s2224_s1 = inlined_call_operand.hbm [shape: bf16[200,128], index: 1, kind: input, shape index: {}]   ;;  %s2225_s2 = inlined_call_operand.vmem [shape: f32[1,128], index: 2, kind: input, shape index: {}]   ;;  %s2226_s3 = inlined_call_operand.vmem [shape: f32[1,128], index: 3, kind: input, shape index: {}]   ;;  %s2227_s4 = inlined_call_operand.vmem [shape: f32[2,16,16,8], index: 4, kind: output, shape index: {}]  }
   0x1   :  { %11 = vsyncpa [#allocation3 + $0x1], 0 }
   0x2   :  { %12 = vsyncpa [#allocation5], 0  ;;  %s1635_s15 = smov 0   ;;  %s1637_s16 = smov 0  }
   0x3   :  { %s1639_s17 = smov 0   ;;  %s1641_s18 = smov 0  }
   0x4   :  { %s1643_s19 = smov 0   ;;  %s1645_s20 = smov 0  }
   0x5 LB: > { %s1288_s21 = sadd.s32 4294967295, %s1599_s20   ;;  %p61_p0 = scmp.ne.s32.totalorder %s1583_s16, %s1579_s15  ;;  %s1599_s20 = sphi %s1645_s20, %s18_s20   ;;  %s1595_s19 = sphi %s1643_s19, %s2244_s19   ;;  %s1591_s18 = sphi %s1641_s18, %s2243_s18   ;;  %s1587_s17 = sphi %s1639_s17, %s2242_s17   ;;  %s1583_s16 = sphi %s1637_s16, %s2241_s16   ;;  %s1579_s15 = sphi %s1635_s15, %s2240_s15  }
   0x6   : > { %p1665_p1 = scmp.eq.s32.totalorder %s1288_s21, 0  ;;  %p1290_p2 = scmp.ge.s32.totalorder %s1599_s20, 1 }
   0x7   : > { %p165_p3 = scmp.lt.s32.totalorder %s1599_s20, 3  ;;  %s1601_s25 = smov [#allocation4]  }
   0x8   : > { %s2232_s22 = scalar_select %p1665_p1, 1, 0 }
   0x9   : > { %p1673_p4 = por %p1665_p1, %p61_p0  ;;  %p1677_p5 = pnand %p1290_p2, %p165_p3 }
   0xa   : > { %s177_s26 = sshll.u32 %s1601_s25, 4  ;;  %s37_s28 = sadd.s32 1, %s1595_s19  ;;  %s178_s26 = int_to_ptr.vmem [resolvable:$true] %s177_s26 }
   0xb   : > { %s2233_s23 = scalar_select %p1673_p4, 1, 0 }
   0xc   : > { %s2234_s24 = scalar_select %p1677_p5, 1, 0 }
   0xd   : > { %p1387_p6 = pneg %p1677_p5  ;;  %s1487_s5 = scalar_lea.hbm %s2224_s1, 1600 }
   0xe   : > { %p1488_p8 = scmp.ne.s32.totalorder %s2224_s1, %s1487_s5  ;;  %p1494_p12 = scmp.lt.u32.totalorder %s1487_s5, %s2224_s1 }
   0xf   : > { %p1685_p7 = pnand %p1387_p6, %p1665_p1 }
  0x11   : > { %p1489_p9 = pneg %p1685_p7 }
  0x13   : > { %p1490_p10 = pnand %p1489_p9, %p1488_p8 }
  0x15   : > { %p1491_p11 = pneg %p1490_p10 }
  0x17   : > { %p1496_p13 = pnand %p1494_p12, %p1491_p11 }
  0x19   : > { %1499 = shalt.err (!%p1496_p13)
}
  0x1a   : > { %s1500_s10 = scalar_lea.vmem %s178_s26, 1600  ;;  %p1508_p6 = scmp.lt.s32.totalorder %s178_s26, %s178_s26 }
  0x1b   : > { %p1501_p0 = scmp.ne.s32.totalorder %s178_s26, %s1500_s10  ;;  %p1509_p1 = scmp.lt.s32.totalorder %s1500_s10, %s1500_s10 }
  0x1d   : > { %p1503_p2 = pnand %p1501_p0, %p1489_p9  ;;  %p1510_p4 = por %p1509_p1, %p1508_p6 }
  0x1f   : > { %p1504_p3 = pneg %p1503_p2 }
  0x21   : > { %p1511_p5 = pnand %p1510_p4, %p1504_p3 }
  0x23   : > { %1514 = shalt.err (!%p1511_p5)
}
  0x24   : > { %s1602_s11 = smov 64   ;;  %s1603_s12 = smov 4  }
  0x25   : > { %1390 = dma.hbm_to_vmem [thread:$0]  (!%p1685_p7), %s2224_s1, 1600, %s178_s26, [#allocation5], %s1602_s11, %s1602_s11, %s1603_s12  }
  0x26   : > { %p39_p1 = scmp.ge.s32.totalorder %s37_s28, 2  ;;  %s48_s15 = sadd.s32 1, %s1587_s17 }
  0x27   : > { %p55_p4 = scmp.ne.s32.totalorder %s1587_s17, %s1583_s16  ;;  %p56_p5 = scmp.eq.s32.totalorder %s1599_s20, 0 }
  0x28   : > { %s2246_s28 = smov (%p39_p1, %s37_s28), 0  ;;  %p1396_p9 = scmp.lt.s32.totalorder %s1599_s20, 2 }
  0x29   : > { %p57_p8 = por %p56_p5, %p55_p4  ;;  %s41_s21 = ssub.s32 %s1595_s19, %s2246_s28 }
  0x2a   : > { %s197_s25 = sand.u32 1, %s1587_s17   ;;  %p46_p10 = scmp.eq.s32.totalorder %s41_s21, 0 }
  0x2b   : > { %s1378_s27 = smul.u32 160, %s197_s25  ;;  %p1719_p11 = pnand %p1396_p9, %p57_p8 }
  0x2c   : > { %s1724_s26 = scalar_select %p46_p10, %s1587_s17, %s48_s15  }
  0x2d   : > { %s1379_s30 = smul.u32 2560, %s1595_s19  ;;  %s201_s5 = scalar_lea.vmem [#allocation2], %s1378_s27 }
  0x2e   : > { %s212_s6 = sshll.u32 %s201_s5, 4  ;;  %s1734_s10 = scalar_lea.sflag [#allocation3], %s197_s25  ;;  %s1732_s6 = int_to_ptr.vmem [resolvable:$true] %s212_s6 }
  0x2f   : > { %s1730_s9 = scalar_lea.hbm %s2223_s0, %s1379_s30  ;;  %p1517_p12 = pneg %p1719_p11 }
  0x30   : > { %s1515_s13 = scalar_lea.hbm %s1730_s9, 2560  ;;  %s1520_s21 = scalar_lea.hbm %s2223_s0, 5120 }
  0x31   : > { %p1516_p7 = scmp.ne.s32.totalorder %s1730_s9, %s1515_s13  ;;  %p1521_p2 = scmp.lt.u32.totalorder %s1730_s9, %s2223_s0 }
  0x32   : > { %p1522_p3 = scmp.lt.u32.totalorder %s1520_s21, %s1515_s13  ;;  %p1524_p1 = scmp.lt.u32.totalorder %s1515_s13, %s1730_s9 }
  0x33   : > { %p1518_p13 = pnand %p1517_p12, %p1516_p7 }
  0x34   : > { %p1523_p6 = por %p1522_p3, %p1521_p2 }
  0x35   : > { %p1519_p0 = pneg %p1518_p13 }
  0x36   : > { %p1525_p4 = por %p1524_p1, %p1523_p6 }
  0x38   : > { %p1526_p5 = pnand %p1525_p4, %p1519_p0 }
  0x3a   : > { %1529 = shalt.err (!%p1526_p5)
}
  0x3b   : > { %s1530_s25 = scalar_lea.vmem %s1732_s6, 2560  ;;  %s1604_s5 = smov [#allocation2]  }
  0x3c   : > { %p1531_p8 = scmp.ne.s32.totalorder %s1732_s6, %s1530_s25  ;;  %s1535_s7 = sshll.u32 %s1604_s5, 4  ;;  %s1536_s7 = int_to_ptr.vmem [resolvable:$false] %s1535_s7 }
  0x3d   : > { %s1537_s8 = scalar_lea.vmem %s1536_s7, 5120  ;;  %p1538_p7 = scmp.lt.s32.totalorder %s1732_s6, %s1536_s7 }
  0x3e   : > { %p1533_p9 = pnand %p1531_p8, %p1517_p12  ;;  %p1539_p13 = scmp.lt.s32.totalorder %s1537_s8, %s1530_s25 }
  0x40   : > { %p1534_p10 = pneg %p1533_p9  ;;  %p1540_p2 = por %p1539_p13, %p1538_p7 }
  0x42   : > { %p1541_p3 = pnand %p1540_p2, %p1534_p10 }
  0x44   : > { %1544 = shalt.err (!%p1541_p3)
}
  0x45   : > { %1394 = dma.hbm_to_vmem [thread:$0]  (!%p1719_p11), %s1730_s9, 2560, %s1732_s6, %s1734_s10, %s1602_s11, %s1602_s11, %s1603_s12  }
  0x46   : > { %p2237_p12 = scmp.ne.s32.totalorder %s2234_s24, 0 }
  0x47   : > { %s226_s13 = sand.u32 (!%p2237_p12), 1, %s1583_s16   ;;  %p2238_p0 = scmp.ne.s32.totalorder (!%p2237_p12), %s2233_s23, 0 }
  0x48   : > { %224 = sbr.rel (%p2237_p12) target bundleno = 547 (0x223), region = 36  ;;  %s227_s15 = scalar_lea.sflag (!%p2237_p12), [#allocation3], %s226_s13 }
  0x49   : > { %s1380_s14 = smul.u32 (!%p2237_p12), 160, %s226_s13 }
  0x4b   : > { %s1768_s21 = scalar_lea.vmem (!%p2237_p12), [#allocation2], %s1380_s14 }
  0x4f   : > { %1570 = dma.done.wait (%p2238_p0), %s227_s15, 2560  }
  0x50   : > { %1572 = vsyncadd (%p2238_p0), %s227_s15, 4294964736  ;;  %p2239_p6 = scmp.ne.s32.totalorder %s2232_s22, 0 }
  0x52   : > { %1574 = dma.done.wait (%p2239_p6), [#allocation5], 1600  }
  0x53   : > { %1576 = vsyncadd (%p2239_p6), [#allocation5], 4294965696  ;;  %v1605_v0 = vmov 0   ;;  %v1781_v1 = vld [vmem:[%s1768_s21 + $0x10] sm:$0xff]   ;;  %v1784_v2 = vld [vmem:[%s1768_s21 + $0x8] sm:$0xff]   ;;  %s1606_s23 = smov 80  }
  0x54   : > { %862 = vmatprep.subr.bf16.mxu0 %v1605_v0  ;;  %1352 = vmatprep.subr.bf16.mxu1 %v1605_v0  ;;  %v1789_v3 = vld [vmem:[%s1768_s21 + $0x50] sm:$0xff]   ;;  %s1607_s22 = smov 40   ;;  %v1794_v4 = vld [vmem:[%s1768_s21 + $0x48] sm:$0xff]   ;;  %v1799_v5 = vld [vmem:[%s1768_s21 + $0x58] sm:$0xff]   ;;  %s1608_s24 = smov 120   ;;  %vm858_vm0 = vcmask 1043456  }
  0x55   : > { %448 = vrot.lane.b32.xlu1 %v1781_v1, %s1606_s23  ;;  %411 = vrot.lane.b32.xlu0 %v1784_v2, %s1607_s22  ;;  %v1804_v6 = vld [vmem:[%s1768_s21 + $0x18] sm:$0xff]   ;;  %v1809_v7 = vld [vmem:[%s1768_s21 + $0x60] sm:$0xff]   ;;  %s1609_s11 = smov 32   ;;  %v1471_v10 = vld [vmem:[#allocation4 + $0x8] sm:$0xff]   ;;  %vm554_vm1 = vcmask 326656   ;;  %vm685_vm2 = vcmask 261120  }
  0x56   : > { %v1814_v8 = vld [vmem:[%s1768_s21 + $0x20] sm:$0xff]   ;;  %v1472_v11 = vld [vmem:[#allocation4 + $0x10] sm:$0xff]   ;;  %v1833_v12 = vld [vmem:[%s1768_s21 + $0x68] sm:$0xff]   ;;  %vm825_vm3 = vcmask 588800   ;;  %vm603_vm4 = vcmask 654336   ;;  %vm636_vm5 = vcmask 982016  }
  0x57   : > { %v1470_v9 = vld [vmem:[#allocation4] sm:$0xff]   ;;  %v1473_v13 = vld [vmem:[#allocation4 + $0x18] sm:$0xff]   ;;  %v1840_v14 = vld [vmem:[%s1768_s21 + $0x28] sm:$0xff]   ;;  %p271_p11 = scmp.lt.s32.totalorder %s1591_s18, 1  ;;  %vm1126_vm6 = vcmask 64512  }
  0x58   : > { %863 = vmatpush1.bf16.msra.mxu0 %v1470_v9  ;;  %1365 = vmatpush1.bf16.msra.mxu1 %v1470_v9  ;;  %v1475_v15 = vld [vmem:[#allocation4 + $0x20] sm:$0xff]   ;;  %v1476_v16 = vld [vmem:[#allocation4 + $0x28] sm:$0xff]   ;;  %v1477_v17 = vld [vmem:[#allocation4 + $0x30] sm:$0xff]  }
  0x59   : > { %464 = vrot.lane.b32.xlu1 %v1789_v3, %s1606_s23  ;;  %427 = vrot.lane.b32.xlu0 %v1794_v4, %s1607_s22  ;;  %v1865_v18 = vld [vmem:[%s1768_s21 + $0x70] sm:$0xff]   ;;  %v1478_v19 = vld [vmem:[#allocation4 + $0x38] sm:$0xff]   ;;  %v1480_v21 = vld [vmem:[#allocation4 + $0x40] sm:$0xff]   ;;  %s2248_s18 = smov (!%p271_p11, %s1591_s18), 1 }
  0x5a   : > { %864 = vmatprep.subr.bf16.mxu0 %v1605_v0  ;;  %1353 = vmatprep.subr.bf16.mxu1 %v1605_v0  ;;  %v1870_v20 = vld [vmem:[%s1768_s21 + $0x30] sm:$0xff]   ;;  %v1481_v22 = vld [vmem:[#allocation4 + $0x48] sm:$0xff]   ;;  %v1895_v24 = vld [vmem:[%s1768_s21 + $0x78] sm:$0xff]   ;;  %s1351_s6 = sshll.u32 %s2248_s18, 8 }
  0x5b   : > { %v1483_v23 = vld [vmem:[#allocation4 + $0x50] sm:$0xff]   ;;  %v1484_v25 = vld [vmem:[#allocation4 + $0x58] sm:$0xff]   ;;  %v1486_v27 = vld [vmem:[#allocation4 + $0x60] ss:$0 sps:$4 sm:$0xff]   ;;  %s2077_s25 = scalar_lea.vmem %s2227_s4, %s1351_s6 }
  0x5c   : > { %865 = vmatpush1.bf16.msra.mxu0 %v1471_v10  ;;  %1366 = vmatpush1.bf16.msra.mxu1 %v1471_v10  ;;  %v1900_v26 = vld [vmem:[%s1768_s21 + $0x38] sm:$0xff]   ;;  %v860_v28 = vsel %vm858_vm0, %v1486_v27, 0  ;;  %v1468_v29 = vld [vmem:[%s1768_s21 + $0x80] sm:$0xff]   ;;  %v1474_v31 = vld [vmem:[%s1768_s21 + $0x88] sm:$0xff]  }
  0x5d   : > { %501 = vrot.lane.b32.xlu1 %v1799_v5, %s1608_s24  ;;  %485 = vrot.lane.b32.xlu0 %v1804_v6, %s1608_s24  ;;  %v1469_v30 = vld [vmem:[%s1768_s21 + $0x40] sm:$0xff]   ;;  %v1479_v32 = vld [vmem:[%s1768_s21 + $0x90] sm:$0xff]  }
  0x5e   : > { %866 = vmatprep.subr.bf16.mxu0 %v1605_v0  ;;  %1354 = vmatprep.subr.bf16.mxu1 %v1605_v0  ;;  %v1485_v37 = vld [vmem:[%s1768_s21 + $0x98] sm:$0xff]   ;;  %v1482_v38 = vld [vmem:[%s1768_s21] sm:$0xff]  }
  0x60   : > { %867 = vmatpush1.bf16.msra.mxu0 %v1472_v11  ;;  %1367 = vmatpush1.bf16.msra.mxu1 %v1472_v11 }
  0x61   : > { %538 = vrot.lane.b32.xlu1 %v1809_v7, %s1609_s11  ;;  %522 = vrot.lane.b32.xlu0 %v1814_v8, %s1609_s11 }
  0x62   : > { %868 = vmatprep.subr.bf16.mxu0 %v1605_v0  ;;  %1355 = vmatprep.subr.bf16.mxu1 %v1605_v0 }
  0x64   : > { %869 = vmatpush1.bf16.msra.mxu0 %v1473_v13  ;;  %1368 = vmatpush1.bf16.msra.mxu1 %v1473_v13 }
  0x65   : > { %429 = vrot.lane.b32.xlu1 %v1789_v3, %s1607_s22  ;;  %413 = vrot.lane.b32.xlu0 %v1781_v1, %s1607_s22 }
  0x66   : > { %870 = vmatprep.subr.bf16.mxu0 %v1605_v0  ;;  %1356 = vmatprep.subr.bf16.mxu1 %v1605_v0 }
  0x68   : > { %871 = vmatpush1.bf16.msra.mxu0 %v1475_v15  ;;  %1369 = vmatpush1.bf16.msra.mxu1 %v1475_v15 }
  0x69   : > { %466 = vrot.lane.b32.xlu1 %v1799_v5, %s1606_s23  ;;  %450 = vrot.lane.b32.xlu0 %v1804_v6, %s1606_s23 }
  0x6a   : > { %872 = vmatprep.subr.bf16.mxu0 %v1605_v0  ;;  %1357 = vmatprep.subr.bf16.mxu1 %v1605_v0 }
  0x6c   : > { %873 = vmatpush1.bf16.msra.mxu0 %v1476_v16  ;;  %1370 = vmatpush1.bf16.msra.mxu1 %v1476_v16 }
  0x6d   : > { %503 = vrot.lane.b32.xlu1 %v1809_v7, %s1608_s24  ;;  %487 = vrot.lane.b32.xlu0 %v1814_v8, %s1608_s24 }
  0x6e   : > { %874 = vmatprep.subr.bf16.mxu0 %v1605_v0  ;;  %1358 = vmatprep.subr.bf16.mxu1 %v1605_v0 }
  0x70   : > { %875 = vmatpush1.bf16.msra.mxu0 %v1477_v17  ;;  %1371 = vmatpush1.bf16.msra.mxu1 %v1477_v17 }
  0x71   : > { %540 = vrot.lane.b32.xlu1 %v1833_v12, %s1609_s11  ;;  %524 = vrot.lane.b32.xlu0 %v1840_v14, %s1609_s11 }
  0x72   : > { %876 = vmatprep.subr.bf16.mxu0 %v1605_v0  ;;  %1359 = vmatprep.subr.bf16.mxu1 %v1605_v0 }
  0x74   : > { %877 = vmatpush1.bf16.msra.mxu0 %v1478_v19  ;;  %1372 = vmatpush1.bf16.msra.mxu1 %v1478_v19 }
  0x75   : > { %431 = vrot.lane.b32.xlu1 %v1799_v5, %s1607_s22  ;;  %415 = vrot.lane.b32.xlu0 %v1804_v6, %s1607_s22 }
  0x76   : > { %878 = vmatprep.subr.bf16.mxu0 %v1605_v0  ;;  %1360 = vmatprep.subr.bf16.mxu1 %v1605_v0 }
  0x78   : > { %879 = vmatpush1.bf16.msra.mxu0 %v1480_v21  ;;  %1373 = vmatpush1.bf16.msra.mxu1 %v1480_v21 }
  0x79   : > { %468 = vrot.lane.b32.xlu1 %v1809_v7, %s1606_s23  ;;  %452 = vrot.lane.b32.xlu0 %v1814_v8, %s1606_s23 }
  0x7a   : > { %880 = vmatprep.subr.bf16.mxu0 %v1605_v0  ;;  %1361 = vmatprep.subr.bf16.mxu1 %v1605_v0 }
  0x7c   : > { %881 = vmatpush1.bf16.msra.mxu0 %v1481_v22  ;;  %1374 = vmatpush1.bf16.msra.mxu1 %v1481_v22 }
  0x7d   : > { %505 = vrot.lane.b32.xlu1 %v1833_v12, %s1608_s24  ;;  %489 = vrot.lane.b32.xlu0 %v1840_v14, %s1608_s24 }
  0x7e   : > { %882 = vmatprep.subr.bf16.mxu0 %v1605_v0  ;;  %1362 = vmatprep.subr.bf16.mxu1 %v1605_v0 }
  0x80   : > { %883 = vmatpush1.bf16.msra.mxu0 %v1483_v23  ;;  %1375 = vmatpush1.bf16.msra.mxu1 %v1483_v23 }
  0x81   : > { %542 = vrot.lane.b32.xlu1 %v1865_v18, %s1609_s11  ;;  %526 = vrot.lane.b32.xlu0 %v1870_v20, %s1609_s11 }
  0x82   : > { %884 = vmatprep.subr.bf16.mxu0 %v1605_v0  ;;  %1363 = vmatprep.subr.bf16.mxu1 %v1605_v0 }
  0x84   : > { %885 = vmatpush1.bf16.msra.mxu0 %v1484_v25  ;;  %1376 = vmatpush1.bf16.msra.mxu1 %v1484_v25 }
  0x85   : > { %433 = vrot.lane.b32.xlu1 %v1809_v7, %s1607_s22  ;;  %417 = vrot.lane.b32.xlu0 %v1814_v8, %s1607_s22 }
  0x86   : > { %886 = vmatprep.subr.bf16.mxu0 %v1605_v0  ;;  %1364 = vmatprep.subr.bf16.mxu1 %v1605_v0 }
  0x88   : > { %887 = vmatpush1.bf16.msra.mxu0 %v860_v28  ;;  %1377 = vmatpush1.bf16.msra.mxu1 %v860_v28 }
  0x89   : > { %470 = vrot.lane.b32.xlu1 %v1833_v12, %s1606_s23  ;;  %454 = vrot.lane.b32.xlu0 %v1840_v14, %s1606_s23 }
  0x8d   : > { %507 = vrot.lane.b32.xlu1 %v1865_v18, %s1608_s24  ;;  %491 = vrot.lane.b32.xlu0 %v1870_v20, %s1608_s24 }
  0x91   : > { %544 = vrot.lane.b32.xlu1 %v1895_v24, %s1609_s11  ;;  %528 = vrot.lane.b32.xlu0 %v1900_v26, %s1609_s11 }
  0x95   : > { %435 = vrot.lane.b32.xlu1 %v1833_v12, %s1607_s22  ;;  %419 = vrot.lane.b32.xlu0 %v1840_v14, %s1607_s22 }
  0x99   : > { %472 = vrot.lane.b32.xlu1 %v1865_v18, %s1606_s23  ;;  %456 = vrot.lane.b32.xlu0 %v1870_v20, %s1606_s23 }
  0x9d   : > { %509 = vrot.lane.b32.xlu1 %v1895_v24, %s1608_s24  ;;  %493 = vrot.lane.b32.xlu0 %v1900_v26, %s1608_s24 }
  0xa1   : > { %546 = vrot.lane.b32.xlu1 %v1468_v29, %s1609_s11  ;;  %530 = vrot.lane.b32.xlu0 %v1469_v30, %s1609_s11 }
  0xa5   : > { %437 = vrot.lane.b32.xlu1 %v1865_v18, %s1607_s22  ;;  %421 = vrot.lane.b32.xlu0 %v1870_v20, %s1607_s22 }
  0xa9   : > { %474 = vrot.lane.b32.xlu1 %v1895_v24, %s1606_s23  ;;  %458 = vrot.lane.b32.xlu0 %v1900_v26, %s1606_s23 }
  0xad   : > { %511 = vrot.lane.b32.xlu1 %v1468_v29, %s1608_s24  ;;  %495 = vrot.lane.b32.xlu0 %v1469_v30, %s1608_s24 }
  0xb1   : > { %548 = vrot.lane.b32.xlu1 %v1474_v31, %s1609_s11  ;;  %532 = vrot.lane.b32.xlu0 %v1794_v4, %s1609_s11 }
  0xb5   : > { %439 = vrot.lane.b32.xlu1 %v1895_v24, %s1607_s22  ;;  %423 = vrot.lane.b32.xlu0 %v1900_v26, %s1607_s22 }
  0xb9   : > { %476 = vrot.lane.b32.xlu1 %v1468_v29, %s1606_s23  ;;  %460 = vrot.lane.b32.xlu0 %v1469_v30, %s1606_s23 }
  0xbd   : > { %513 = vrot.lane.b32.xlu1 %v1474_v31, %s1608_s24  ;;  %497 = vrot.lane.b32.xlu0 %v1794_v4, %s1608_s24 }
  0xc1   : > { %550 = vrot.lane.b32.xlu1 %v1479_v32, %s1609_s11  ;;  %534 = vrot.lane.b32.xlu0 %v1789_v3, %s1609_s11 }
  0xc5   : > { %441 = vrot.lane.b32.xlu1 %v1468_v29, %s1607_s22  ;;  %425 = vrot.lane.b32.xlu0 %v1469_v30, %s1607_s22 }
  0xc7   : > { %v449_v33 = vpop.permute.xlu1 %448  ;;  %v412_v34 = vpop.permute.xlu0 %411 }
  0xc8   : > { %v557_v42 = vsel %vm554_vm1, %v1482_v38, %v412_v34 }
  0xc9   : > { %478 = vrot.lane.b32.xlu1 %v1474_v31, %s1606_s23  ;;  %462 = vrot.lane.b32.xlu0 %v1794_v4, %s1606_s23  ;;  %v605_v48 = vsel %vm603_vm4, %v557_v42, %v449_v33 }
  0xcb   : > { %v465_v35 = vpop.permute.xlu1 %464  ;;  %v428_v36 = vpop.permute.xlu0 %427 }
  0xcc   : > { %v581_v41 = vsel %vm554_vm1, %v1469_v30, %v428_v36 }
  0xcd   : > { %515 = vrot.lane.b32.xlu1 %v1479_v32, %s1608_s24  ;;  %499 = vrot.lane.b32.xlu0 %v1789_v3, %s1608_s24  ;;  %v621_v46 = vsel %vm603_vm4, %v581_v41, %v465_v35 }
  0xcf   : > { %v502_v39 = vpop.permute.xlu1 %501  ;;  %v486_v40 = vpop.permute.xlu0 %485 }
  0xd0   : > { %v662_v49 = vsel %vm636_vm5, %v621_v46, %v502_v39  ;;  %v638_v50 = vsel %vm636_vm5, %v605_v48, %v486_v40 }
  0xd1   : > { %552 = vrot.lane.b32.xlu1 %v1485_v37, %s1609_s11  ;;  %536 = vrot.lane.b32.xlu0 %v1799_v5, %s1609_s11 }
  0xd3   : > { %v539_v43 = vpop.permute.xlu1 %538  ;;  %v523_v44 = vpop.permute.xlu0 %522 }
  0xd4   : > { %v703_v45 = vsel %vm685_vm2, %v502_v39, %v539_v43  ;;  %v687_v47 = vsel %vm685_vm2, %v486_v40, %v523_v44 }
  0xd5   : > { %1340 = vmatprep.mubr.msk.bf16.mxu1 %vm825_vm3, %v703_v45  ;;  %1332 = vmatprep.mubr.msk.bf16.mxu0 %vm825_vm3, %v687_v47 }
  0xd6   : > { %959 = vmatmul.mubr.bf16.vlgmr.msra.gmra.mrb[0].mxu1 %v662_v49  ;;  %895 = vmatmul.mubr.bf16.vlgmr.msra.gmra.mrb[0].mxu0 %v638_v50 }
  0xd7   : > { %v430_v51 = vpop.permute.xlu1 %429  ;;  %v414_v52 = vpop.permute.xlu0 %413 }
  0xd8   : > { %v584_v57 = vsel %vm554_vm1, %v1794_v4, %v430_v51  ;;  %v560_v59 = vsel %vm554_vm1, %v1784_v2, %v414_v52 }
  0xdb   : > { %v467_v53 = vpop.permute.xlu1 %466  ;;  %v451_v54 = vpop.permute.xlu0 %450 }
  0xdc   : > { %v623_v60 = vsel %vm603_vm4, %v584_v57, %v467_v53  ;;  %v607_v63 = vsel %vm603_vm4, %v560_v59, %v451_v54 }
  0xdf   : > { %v504_v55 = vpop.permute.xlu1 %503  ;;  %v488_v56 = vpop.permute.xlu0 %487 }
  0xe0   : > { %v665_v9 = vsel %vm636_vm5, %v623_v60, %v504_v55  ;;  %v641_v4 = vsel %vm636_vm5, %v607_v63, %v488_v56 }
  0xe3   : > { %v541_v58 = vpop.permute.xlu1 %540  ;;  %v525_v62 = vpop.permute.xlu0 %524 }
  0xe4   : > { %v705_v61 = vsel %vm685_vm2, %v504_v55, %v541_v58  ;;  %v689_v0 = vsel %vm685_vm2, %v488_v56, %v525_v62 }
  0xe5   : > { %1341 = vmatprep.mubr.msk.bf16.mxu1 %vm825_vm3, %v705_v61  ;;  %1333 = vmatprep.mubr.msk.bf16.mxu0 %vm825_vm3, %v689_v0 }
  0xe6   : > { %967 = vmatmul.mubr.bf16.gmra.mrb[4].mxu1 %v665_v9  ;;  %903 = vmatmul.mubr.bf16.gmra.mrb[4].mxu0 %v641_v4 }
  0xe7   : > { %v432_v2 = vpop.permute.xlu1 %431  ;;  %v416_v10 = vpop.permute.xlu0 %415 }
  0xe8   : > { %v587_v17 = vsel %vm554_vm1, %v1789_v3, %v432_v2  ;;  %v563_v21 = vsel %vm554_vm1, %v1781_v1, %v416_v10 }
  0xeb   : > { %v469_v11 = vpop.permute.xlu1 %468  ;;  %v453_v13 = vpop.permute.xlu0 %452 }
  0xec   : > { %v625_v22 = vsel %vm603_vm4, %v587_v17, %v469_v11  ;;  %v609_v27 = vsel %vm603_vm4, %v563_v21, %v453_v13 }
  0xef   : > { %v506_v15 = vpop.permute.xlu1 %505  ;;  %v490_v16 = vpop.permute.xlu0 %489 }
  0xf0   : > { %v668_v29 = vsel %vm636_vm5, %v625_v22, %v506_v15  ;;  %v644_v3 = vsel %vm636_vm5, %v609_v27, %v490_v16 }
  0xf3   : > { %v543_v19 = vpop.permute.xlu1 %542  ;;  %v527_v25 = vpop.permute.xlu0 %526 }
  0xf4   : > { %v707_v23 = vsel %vm685_vm2, %v506_v15, %v543_v19  ;;  %v691_v28 = vsel %vm685_vm2, %v490_v16, %v527_v25 }
  0xf5   : > { %1342 = vmatprep.mubr.msk.bf16.mxu1 %vm825_vm3, %v707_v23  ;;  %1334 = vmatprep.mubr.msk.bf16.mxu0 %vm825_vm3, %v691_v28 }
  0xf6   : > { %975 = vmatmul.mubr.bf16.gmra.mrb[8].mxu1 %v668_v29  ;;  %911 = vmatmul.mubr.bf16.gmra.mrb[8].mxu0 %v644_v3 }
  0xf7   : > { %v434_v1 = vpop.permute.xlu1 %433  ;;  %v418_v30 = vpop.permute.xlu0 %417 }
  0xf8   : > { %v590_v35 = vsel %vm554_vm1, %v1799_v5, %v434_v1  ;;  %v566_v37 = vsel %vm554_vm1, %v1804_v6, %v418_v30 }
  0xfb   : > { %v471_v31 = vpop.permute.xlu1 %470  ;;  %v455_v32 = vpop.permute.xlu0 %454 }
  0xfc   : > { %v627_v38 = vsel %vm603_vm4, %v590_v35, %v471_v31  ;;  %v611_v41 = vsel %vm603_vm4, %v566_v37, %v455_v32 }
  0xff   : > { %v508_v33 = vpop.permute.xlu1 %507  ;;  %v492_v34 = vpop.permute.xlu0 %491 }
 0x100   : > { %v671_v43 = vsel %vm636_vm5, %v627_v38, %v508_v33  ;;  %v647_v5 = vsel %vm636_vm5, %v611_v41, %v492_v34 }
 0x103   : > { %v545_v36 = vpop.permute.xlu1 %544  ;;  %v529_v40 = vpop.permute.xlu0 %528 }
 0x104   : > { %v709_v39 = vsel %vm685_vm2, %v508_v33, %v545_v36  ;;  %v693_v42 = vsel %vm685_vm2, %v492_v34, %v529_v40 }
 0x105   : > { %1343 = vmatprep.mubr.msk.bf16.mxu1 %vm825_vm3, %v709_v39  ;;  %1335 = vmatprep.mubr.msk.bf16.mxu0 %vm825_vm3, %v693_v42 }
 0x106   : > { %983 = vmatmul.mubr.bf16.gmra.mrb[12].mxu1 %v671_v43  ;;  %919 = vmatmul.mubr.bf16.gmra.mrb[12].mxu0 %v647_v5 }
 0x107   : > { %v436_v6 = vpop.permute.xlu1 %435  ;;  %v420_v44 = vpop.permute.xlu0 %419 }
 0x108   : > { %v593_v49 = vsel %vm554_vm1, %v1809_v7, %v436_v6  ;;  %v569_v51 = vsel %vm554_vm1, %v1814_v8, %v420_v44  ;;  %v2070_v44 = vld [vmem:[%s2226_s3] ss:$0 sm:$0xff] }
 0x10b   : > { %v473_v45 = vpop.permute.xlu1 %472  ;;  %v457_v46 = vpop.permute.xlu0 %456 }
 0x10c   : > { %v629_v52 = vsel %vm603_vm4, %v593_v49, %v473_v45  ;;  %v613_v55 = vsel %vm603_vm4, %v569_v51, %v457_v46 }
 0x10f   : > { %v510_v47 = vpop.permute.xlu1 %509  ;;  %v494_v48 = vpop.permute.xlu0 %493 }
 0x110   : > { %v674_v57 = vsel %vm636_vm5, %v629_v52, %v510_v47  ;;  %v650_v7 = vsel %vm636_vm5, %v613_v55, %v494_v48 }
 0x113   : > { %v547_v50 = vpop.permute.xlu1 %546  ;;  %v531_v54 = vpop.permute.xlu0 %530 }
 0x114   : > { %v711_v53 = vsel %vm685_vm2, %v510_v47, %v547_v50  ;;  %v695_v56 = vsel %vm685_vm2, %v494_v48, %v531_v54 }
 0x115   : > { %1344 = vmatprep.mubr.msk.bf16.mxu1 %vm825_vm3, %v711_v53  ;;  %1336 = vmatprep.mubr.msk.bf16.mxu0 %vm825_vm3, %v695_v56 }
 0x116   : > { %991 = vmatmul.mubr.bf16.gmra.mrb[16].mxu1 %v674_v57  ;;  %927 = vmatmul.mubr.bf16.gmra.mrb[16].mxu0 %v650_v7 }
 0x117   : > { %v438_v8 = vpop.permute.xlu1 %437  ;;  %v422_v58 = vpop.permute.xlu0 %421 }
 0x118   : > { %v596_v63 = vsel %vm554_vm1, %v1833_v12, %v438_v8  ;;  %v572_v9 = vsel %vm554_vm1, %v1840_v14, %v422_v58 }
 0x11b   : > { %v475_v59 = vpop.permute.xlu1 %474  ;;  %v459_v60 = vpop.permute.xlu0 %458 }
 0x11c   : > { %v631_v4 = vsel %vm603_vm4, %v596_v63, %v475_v59  ;;  %v615_v11 = vsel %vm603_vm4, %v572_v9, %v459_v60 }
 0x11f   : > { %v512_v61 = vpop.permute.xlu1 %511  ;;  %v496_v62 = vpop.permute.xlu0 %495 }
 0x120   : > { %v677_v15 = vsel %vm636_vm5, %v631_v4, %v512_v61  ;;  %v653_v12 = vsel %vm636_vm5, %v615_v11, %v496_v62 }
 0x123   : > { %v549_v0 = vpop.permute.xlu1 %548  ;;  %v533_v10 = vpop.permute.xlu0 %532 }
 0x124   : > { %v713_v2 = vsel %vm685_vm2, %v512_v61, %v549_v0  ;;  %v697_v13 = vsel %vm685_vm2, %v496_v62, %v533_v10 }
 0x125   : > { %1345 = vmatprep.mubr.msk.bf16.mxu1 %vm825_vm3, %v713_v2  ;;  %1337 = vmatprep.mubr.msk.bf16.mxu0 %vm825_vm3, %v697_v13 }
 0x126   : > { %999 = vmatmul.mubr.bf16.gmra.mrb[20].mxu1 %v677_v15  ;;  %935 = vmatmul.mubr.bf16.gmra.mrb[20].mxu0 %v653_v12 }
 0x127   : > { %v440_v14 = vpop.permute.xlu1 %439  ;;  %v424_v16 = vpop.permute.xlu0 %423 }
 0x128   : > { %v599_v23 = vsel %vm554_vm1, %v1865_v18, %v440_v14  ;;  %v575_v27 = vsel %vm554_vm1, %v1870_v20, %v424_v16 }
 0x12b   : > { %v477_v17 = vpop.permute.xlu1 %476  ;;  %v461_v19 = vpop.permute.xlu0 %460 }
 0x12c   : > { %v633_v28 = vsel %vm603_vm4, %v599_v23, %v477_v17  ;;  %v617_v1 = vsel %vm603_vm4, %v575_v27, %v461_v19 }
 0x12f   : > { %v514_v21 = vpop.permute.xlu1 %513  ;;  %v498_v22 = vpop.permute.xlu0 %497 }
 0x130   : > { %v680_v31 = vsel %vm636_vm5, %v633_v28, %v514_v21  ;;  %v656_v18 = vsel %vm636_vm5, %v617_v1, %v498_v22 }
 0x133   : > { %v551_v25 = vpop.permute.xlu1 %550  ;;  %v535_v3 = vpop.permute.xlu0 %534 }
 0x134   : > { %v715_v29 = vsel %vm685_vm2, %v514_v21, %v551_v25  ;;  %v699_v30 = vsel %vm685_vm2, %v498_v22, %v535_v3 }
 0x135   : > { %1346 = vmatprep.mubr.msk.bf16.mxu1 %vm825_vm3, %v715_v29  ;;  %1338 = vmatprep.mubr.msk.bf16.mxu0 %vm825_vm3, %v699_v30 }
 0x136   : > { %1007 = vmatmul.mubr.bf16.gmra.mrb[24].mxu1 %v680_v31  ;;  %943 = vmatmul.mubr.bf16.gmra.mrb[24].mxu0 %v656_v18 }
 0x137   : > { %v442_v20 = vpop.permute.xlu1 %441  ;;  %v426_v32 = vpop.permute.xlu0 %425 }
 0x138   : > { %v602_v37 = vsel %vm554_vm1, %v1895_v24, %v442_v20  ;;  %v578_v39 = vsel %vm554_vm1, %v1900_v26, %v426_v32  ;;  %v2065_v26 = vld [vmem:[%s2225_s2] ss:$0 sm:$0xff] }
 0x13b   : > { %v479_v33 = vpop.permute.xlu1 %478  ;;  %v463_v34 = vpop.permute.xlu0 %462 }
 0x13c   : > { %v635_v40 = vsel %vm603_vm4, %v602_v37, %v479_v33  ;;  %v619_v43 = vsel %vm603_vm4, %v578_v39, %v463_v34 }
 0x13f   : > { %v516_v35 = vpop.permute.xlu1 %515  ;;  %v500_v36 = vpop.permute.xlu0 %499 }
 0x140   : > { %v683_v6 = vsel %vm636_vm5, %v635_v40, %v516_v35  ;;  %v659_v24 = vsel %vm636_vm5, %v619_v43, %v500_v36 }
 0x143   : > { %v553_v38 = vpop.permute.xlu1 %552  ;;  %v537_v42 = vpop.permute.xlu0 %536 }
 0x144   : > { %v717_v41 = vsel %vm685_vm2, %v516_v35, %v553_v38  ;;  %v701_v5 = vsel %vm685_vm2, %v500_v36, %v537_v42 }
 0x145   : > { %1347 = vmatprep.mubr.msk.bf16.mxu1 %vm825_vm3, %v717_v41  ;;  %1339 = vmatprep.mubr.msk.bf16.mxu0 %vm825_vm3, %v701_v5 }
 0x146   : > { %1015 = vmatmul.mubr.bf16.gmra.mrb[28].mxu1 %v683_v6  ;;  %951 = vmatmul.mubr.bf16.gmra.mrb[28].mxu0 %v659_v24 }
 0x1a9   : > { %v960_v45 = vpop.f32.mrb[0].mxu1  ;;  %v896_v46 = vpop.f32.mrb[0].mxu0 }
 0x1aa   : > { %v961_v47 = vadd.f32 %v2065_v26, %v960_v45  ;;  %v962_v48 = vpop.f32.mrb[1].mxu1  ;;  %v897_v49 = vadd.f32 %v2065_v26, %v896_v46  ;;  %v898_v50 = vpop.f32.mrb[1].mxu0 }
 0x1ab   : > { %v963_v51 = vpop.f32.mrb[2].mxu1  ;;  %v899_v53 = vpop.f32.mrb[2].mxu0 }
 0x1ac   : > { %vm1039_vm7 = vcmp.ge.f32.partialorder %v961_v47, 0.0  ;;  %v1078_v52 = vmul.f32 %v2070_v44, %v961_v47  ;;  %v964_v54 = vadd.f32 %v2065_v26, %v963_v51  ;;  %v965_v55 = vpop.f32.mrb[3].mxu1  ;;  %vm1023_vm8 = vcmp.ge.f32.partialorder %v897_v49, 0.0  ;;  %v901_v7 = vpop.f32.mrb[3].mxu0 }
 0x1ad   : > { %v1062_v56 = vmul.f32 %v2070_v44, %v897_v49  ;;  %v900_v57 = vadd.f32 %v2065_v26, %v899_v53 }
 0x1ae   : > { %v1110_v8 = vsel %vm1039_vm7, %v961_v47, %v1078_v52  ;;  %vm1040_vm9 = vcmp.ge.f32.partialorder %v964_v54, 0.0  ;;  %v1079_v58 = vmul.f32 %v2070_v44, %v964_v54 }
 0x1af   : > { %v1094_v59 = vsel %vm1023_vm8, %v897_v49, %v1062_v56  ;;  %1143 = vst.msk [vmem:[%s2077_s25 + $0x80] sm:$0xff] %vm1126_vm6, %v1110_v8  ;;  %vm1024_vm10 = vcmp.ge.f32.partialorder %v900_v57, 0.0  ;;  %v1063_v60 = vmul.f32 %v2070_v44, %v900_v57 }
 0x1b0   : > { %1127 = vst.msk [vmem:[%s2077_s25] sm:$0xff] %vm1126_vm6, %v1094_v59  ;;  %v1111_v61 = vsel %vm1040_vm9, %v964_v54, %v1079_v58 }
 0x1b1   : > { %v1095_v62 = vsel %vm1024_vm10, %v900_v57, %v1063_v60  ;;  %1144 = vst.msk [vmem:[%s2077_s25 + $0x88] sm:$0xff] %vm1126_vm6, %v1111_v61 }
 0x1b2   : > { %1128 = vst.msk [vmem:[%s2077_s25 + $0x8] sm:$0xff] %vm1126_vm6, %v1095_v62 }
 0x1b9   : > { %v968_v63 = vpop.f32.mrb[4].mxu1  ;;  %v904_v0 = vpop.f32.mrb[4].mxu0 }
 0x1ba   : > { %v969_v9 = vadd.f32 %v2065_v26, %v968_v63  ;;  %v970_v4 = vpop.f32.mrb[5].mxu1  ;;  %v905_v2 = vadd.f32 %v2065_v26, %v904_v0  ;;  %v906_v10 = vpop.f32.mrb[5].mxu0 }
 0x1bb   : > { %v971_v11 = vpop.f32.mrb[6].mxu1  ;;  %v907_v15 = vpop.f32.mrb[6].mxu0 }
 0x1bc   : > { %vm1041_vm11 = vcmp.ge.f32.partialorder %v969_v9, 0.0  ;;  %v1080_v13 = vmul.f32 %v2070_v44, %v969_v9  ;;  %v972_v12 = vadd.f32 %v2065_v26, %v971_v11  ;;  %v973_v14 = vpop.f32.mrb[7].mxu1  ;;  %vm1025_vm12 = vcmp.ge.f32.partialorder %v905_v2, 0.0  ;;  %v909_v19 = vpop.f32.mrb[7].mxu0 }
 0x1bd   : > { %v1064_v16 = vmul.f32 %v2070_v44, %v905_v2  ;;  %v908_v17 = vadd.f32 %v2065_v26, %v907_v15 }
 0x1be   : > { %v1112_v21 = vsel %vm1041_vm11, %v969_v9, %v1080_v13  ;;  %vm1042_vm13 = vcmp.ge.f32.partialorder %v972_v12, 0.0  ;;  %v1081_v22 = vmul.f32 %v2070_v44, %v972_v12 }
 0x1bf   : > { %v1096_v23 = vsel %vm1025_vm12, %v905_v2, %v1064_v16  ;;  %1145 = vst.msk [vmem:[%s2077_s25 + $0x90] sm:$0xff] %vm1126_vm6, %v1112_v21  ;;  %vm1026_vm14 = vcmp.ge.f32.partialorder %v908_v17, 0.0  ;;  %v1065_v25 = vmul.f32 %v2070_v44, %v908_v17 }
 0x1c0   : > { %1129 = vst.msk [vmem:[%s2077_s25 + $0x10] sm:$0xff] %vm1126_vm6, %v1096_v23  ;;  %v1113_v27 = vsel %vm1042_vm13, %v972_v12, %v1081_v22 }
 0x1c1   : > { %v1097_v28 = vsel %vm1026_vm14, %v908_v17, %v1065_v25  ;;  %1146 = vst.msk [vmem:[%s2077_s25 + $0x98] sm:$0xff] %vm1126_vm6, %v1113_v27 }
 0x1c2   : > { %1130 = vst.msk [vmem:[%s2077_s25 + $0x18] sm:$0xff] %vm1126_vm6, %v1097_v28 }
 0x1c9   : > { %v976_v29 = vpop.f32.mrb[8].mxu1  ;;  %v912_v3 = vpop.f32.mrb[8].mxu0 }
 0x1ca   : > { %v977_v1 = vadd.f32 %v2065_v26, %v976_v29  ;;  %v978_v30 = vpop.f32.mrb[9].mxu1  ;;  %v913_v31 = vadd.f32 %v2065_v26, %v912_v3  ;;  %v914_v18 = vpop.f32.mrb[9].mxu0 }
 0x1cb   : > { %v979_v20 = vpop.f32.mrb[10].mxu1  ;;  %v915_v33 = vpop.f32.mrb[10].mxu0 }
 0x1cc   : > { %vm1043_vm15 = vcmp.ge.f32.partialorder %v977_v1, 0.0  ;;  %v1082_v32 = vmul.f32 %v2070_v44, %v977_v1  ;;  %v980_v34 = vadd.f32 %v2065_v26, %v979_v20  ;;  %v981_v35 = vpop.f32.mrb[11].mxu1  ;;  %vm1027_vm0 = vcmp.ge.f32.partialorder %v913_v31, 0.0  ;;  %v917_v38 = vpop.f32.mrb[11].mxu0 }
 0x1cd   : > { %v1066_v36 = vmul.f32 %v2070_v44, %v913_v31  ;;  %v916_v37 = vadd.f32 %v2065_v26, %v915_v33 }
 0x1ce   : > { %v1114_v39 = vsel %vm1043_vm15, %v977_v1, %v1082_v32  ;;  %vm1044_vm1 = vcmp.ge.f32.partialorder %v980_v34, 0.0  ;;  %v1083_v40 = vmul.f32 %v2070_v44, %v980_v34 }
 0x1cf   : > { %v1098_v41 = vsel %vm1027_vm0, %v913_v31, %v1066_v36  ;;  %1147 = vst.msk [vmem:[%s2077_s25 + $0xa0] sm:$0xff] %vm1126_vm6, %v1114_v39  ;;  %vm1028_vm2 = vcmp.ge.f32.partialorder %v916_v37, 0.0  ;;  %v1067_v42 = vmul.f32 %v2070_v44, %v916_v37 }
 0x1d0   : > { %1131 = vst.msk [vmem:[%s2077_s25 + $0x20] sm:$0xff] %vm1126_vm6, %v1098_v41  ;;  %v1115_v43 = vsel %vm1044_vm1, %v980_v34, %v1083_v40 }
 0x1d1   : > { %v1099_v5 = vsel %vm1028_vm2, %v916_v37, %v1067_v42  ;;  %1148 = vst.msk [vmem:[%s2077_s25 + $0xa8] sm:$0xff] %vm1126_vm6, %v1115_v43 }
 0x1d2   : > { %1132 = vst.msk [vmem:[%s2077_s25 + $0x28] sm:$0xff] %vm1126_vm6, %v1099_v5 }
 0x1d9   : > { %v984_v6 = vpop.f32.mrb[12].mxu1  ;;  %v920_v24 = vpop.f32.mrb[12].mxu0 }
 0x1da   : > { %v985_v45 = vadd.f32 %v2065_v26, %v984_v6  ;;  %v986_v46 = vpop.f32.mrb[13].mxu1  ;;  %v921_v47 = vadd.f32 %v2065_v26, %v920_v24  ;;  %v922_v48 = vpop.f32.mrb[13].mxu0 }
 0x1db   : > { %v987_v49 = vpop.f32.mrb[14].mxu1  ;;  %v923_v51 = vpop.f32.mrb[14].mxu0 }
 0x1dc   : > { %vm1045_vm3 = vcmp.ge.f32.partialorder %v985_v45, 0.0  ;;  %v1084_v50 = vmul.f32 %v2070_v44, %v985_v45  ;;  %v988_v52 = vadd.f32 %v2065_v26, %v987_v49  ;;  %v989_v53 = vpop.f32.mrb[15].mxu1  ;;  %vm1029_vm4 = vcmp.ge.f32.partialorder %v921_v47, 0.0  ;;  %v925_v56 = vpop.f32.mrb[15].mxu0 }
 0x1dd   : > { %v1068_v54 = vmul.f32 %v2070_v44, %v921_v47  ;;  %v924_v55 = vadd.f32 %v2065_v26, %v923_v51 }
 0x1de   : > { %v1116_v57 = vsel %vm1045_vm3, %v985_v45, %v1084_v50  ;;  %vm1046_vm5 = vcmp.ge.f32.partialorder %v988_v52, 0.0  ;;  %v1085_v7 = vmul.f32 %v2070_v44, %v988_v52 }
 0x1df   : > { %v1100_v8 = vsel %vm1029_vm4, %v921_v47, %v1068_v54  ;;  %1149 = vst.msk [vmem:[%s2077_s25 + $0xb0] sm:$0xff] %vm1126_vm6, %v1116_v57  ;;  %vm1030_vm7 = vcmp.ge.f32.partialorder %v924_v55, 0.0  ;;  %v1069_v58 = vmul.f32 %v2070_v44, %v924_v55 }
 0x1e0   : > { %1133 = vst.msk [vmem:[%s2077_s25 + $0x30] sm:$0xff] %vm1126_vm6, %v1100_v8  ;;  %v1117_v59 = vsel %vm1046_vm5, %v988_v52, %v1085_v7 }
 0x1e1   : > { %v1101_v60 = vsel %vm1030_vm7, %v924_v55, %v1069_v58  ;;  %1150 = vst.msk [vmem:[%s2077_s25 + $0xb8] sm:$0xff] %vm1126_vm6, %v1117_v59 }
 0x1e2   : > { %1134 = vst.msk [vmem:[%s2077_s25 + $0x38] sm:$0xff] %vm1126_vm6, %v1101_v60 }
 0x1e9   : > { %v992_v61 = vpop.f32.mrb[16].mxu1  ;;  %v928_v62 = vpop.f32.mrb[16].mxu0 }
 0x1ea   : > { %v993_v63 = vadd.f32 %v2065_v26, %v992_v61  ;;  %v994_v0 = vpop.f32.mrb[17].mxu1  ;;  %v929_v9 = vadd.f32 %v2065_v26, %v928_v62  ;;  %v930_v4 = vpop.f32.mrb[17].mxu0 }
 0x1eb   : > { %v995_v2 = vpop.f32.mrb[18].mxu1  ;;  %v931_v11 = vpop.f32.mrb[18].mxu0 }
 0x1ec   : > { %vm1047_vm8 = vcmp.ge.f32.partialorder %v993_v63, 0.0  ;;  %v1086_v10 = vmul.f32 %v2070_v44, %v993_v63  ;;  %v996_v13 = vadd.f32 %v2065_v26, %v995_v2  ;;  %v997_v15 = vpop.f32.mrb[19].mxu1  ;;  %vm1031_vm9 = vcmp.ge.f32.partialorder %v929_v9, 0.0  ;;  %v933_v16 = vpop.f32.mrb[19].mxu0 }
 0x1ed   : > { %v1070_v12 = vmul.f32 %v2070_v44, %v929_v9  ;;  %v932_v14 = vadd.f32 %v2065_v26, %v931_v11 }
 0x1ee   : > { %v1118_v17 = vsel %vm1047_vm8, %v993_v63, %v1086_v10  ;;  %vm1048_vm10 = vcmp.ge.f32.partialorder %v996_v13, 0.0  ;;  %v1087_v19 = vmul.f32 %v2070_v44, %v996_v13 }
 0x1ef   : > { %v1102_v21 = vsel %vm1031_vm9, %v929_v9, %v1070_v12  ;;  %1151 = vst.msk [vmem:[%s2077_s25 + $0xc0] sm:$0xff] %vm1126_vm6, %v1118_v17  ;;  %vm1032_vm11 = vcmp.ge.f32.partialorder %v932_v14, 0.0  ;;  %v1071_v22 = vmul.f32 %v2070_v44, %v932_v14 }
 0x1f0   : > { %1135 = vst.msk [vmem:[%s2077_s25 + $0x40] sm:$0xff] %vm1126_vm6, %v1102_v21  ;;  %v1119_v23 = vsel %vm1048_vm10, %v996_v13, %v1087_v19 }
 0x1f1   : > { %v1103_v25 = vsel %vm1032_vm11, %v932_v14, %v1071_v22  ;;  %1152 = vst.msk [vmem:[%s2077_s25 + $0xc8] sm:$0xff] %vm1126_vm6, %v1119_v23 }
 0x1f2   : > { %1136 = vst.msk [vmem:[%s2077_s25 + $0x48] sm:$0xff] %vm1126_vm6, %v1103_v25 }
 0x1f9   : > { %v1000_v27 = vpop.f32.mrb[20].mxu1  ;;  %v936_v28 = vpop.f32.mrb[20].mxu0 }
 0x1fa   : > { %v1001_v29 = vadd.f32 %v2065_v26, %v1000_v27  ;;  %v1002_v3 = vpop.f32.mrb[21].mxu1  ;;  %v937_v1 = vadd.f32 %v2065_v26, %v936_v28  ;;  %v938_v30 = vpop.f32.mrb[21].mxu0 }
 0x1fb   : > { %v1003_v31 = vpop.f32.mrb[22].mxu1  ;;  %v939_v20 = vpop.f32.mrb[22].mxu0 }
 0x1fc   : > { %vm1049_vm12 = vcmp.ge.f32.partialorder %v1001_v29, 0.0  ;;  %v1088_v18 = vmul.f32 %v2070_v44, %v1001_v29  ;;  %v1004_v32 = vadd.f32 %v2065_v26, %v1003_v31  ;;  %v1005_v33 = vpop.f32.mrb[23].mxu1  ;;  %vm1033_vm13 = vcmp.ge.f32.partialorder %v937_v1, 0.0  ;;  %v941_v36 = vpop.f32.mrb[23].mxu0 }
 0x1fd   : > { %v1072_v34 = vmul.f32 %v2070_v44, %v937_v1  ;;  %v940_v35 = vadd.f32 %v2065_v26, %v939_v20 }
 0x1fe   : > { %v1120_v37 = vsel %vm1049_vm12, %v1001_v29, %v1088_v18  ;;  %vm1050_vm14 = vcmp.ge.f32.partialorder %v1004_v32, 0.0  ;;  %v1089_v38 = vmul.f32 %v2070_v44, %v1004_v32 }
 0x1ff   : > { %v1104_v39 = vsel %vm1033_vm13, %v937_v1, %v1072_v34  ;;  %1153 = vst.msk [vmem:[%s2077_s25 + $0xd0] sm:$0xff] %vm1126_vm6, %v1120_v37  ;;  %vm1034_vm15 = vcmp.ge.f32.partialorder %v940_v35, 0.0  ;;  %v1073_v40 = vmul.f32 %v2070_v44, %v940_v35 }
 0x200   : > { %1137 = vst.msk [vmem:[%s2077_s25 + $0x50] sm:$0xff] %vm1126_vm6, %v1104_v39  ;;  %v1121_v41 = vsel %vm1050_vm14, %v1004_v32, %v1089_v38 }
 0x201   : > { %v1105_v42 = vsel %vm1034_vm15, %v940_v35, %v1073_v40  ;;  %1154 = vst.msk [vmem:[%s2077_s25 + $0xd8] sm:$0xff] %vm1126_vm6, %v1121_v41 }
 0x202   : > { %1138 = vst.msk [vmem:[%s2077_s25 + $0x58] sm:$0xff] %vm1126_vm6, %v1105_v42 }
 0x209   : > { %v1008_v43 = vpop.f32.mrb[24].mxu1  ;;  %v944_v5 = vpop.f32.mrb[24].mxu0 }
 0x20a   : > { %v1009_v6 = vadd.f32 %v2065_v26, %v1008_v43  ;;  %v1010_v24 = vpop.f32.mrb[25].mxu1  ;;  %v945_v45 = vadd.f32 %v2065_v26, %v944_v5  ;;  %v946_v46 = vpop.f32.mrb[25].mxu0 }
 0x20b   : > { %v1011_v47 = vpop.f32.mrb[26].mxu1  ;;  %v947_v49 = vpop.f32.mrb[26].mxu0 }
 0x20c   : > { %vm1051_vm0 = vcmp.ge.f32.partialorder %v1009_v6, 0.0  ;;  %v1090_v48 = vmul.f32 %v2070_v44, %v1009_v6  ;;  %v1012_v50 = vadd.f32 %v2065_v26, %v1011_v47  ;;  %v1013_v51 = vpop.f32.mrb[27].mxu1  ;;  %vm1035_vm1 = vcmp.ge.f32.partialorder %v945_v45, 0.0  ;;  %v949_v54 = vpop.f32.mrb[27].mxu0 }
 0x20d   : > { %v1074_v52 = vmul.f32 %v2070_v44, %v945_v45  ;;  %v948_v53 = vadd.f32 %v2065_v26, %v947_v49 }
 0x20e   : > { %v1122_v55 = vsel %vm1051_vm0, %v1009_v6, %v1090_v48  ;;  %vm1052_vm2 = vcmp.ge.f32.partialorder %v1012_v50, 0.0  ;;  %v1091_v56 = vmul.f32 %v2070_v44, %v1012_v50 }
 0x20f   : > { %v1106_v57 = vsel %vm1035_vm1, %v945_v45, %v1074_v52  ;;  %1155 = vst.msk [vmem:[%s2077_s25 + $0xe0] sm:$0xff] %vm1126_vm6, %v1122_v55  ;;  %vm1036_vm3 = vcmp.ge.f32.partialorder %v948_v53, 0.0  ;;  %v1075_v7 = vmul.f32 %v2070_v44, %v948_v53 }
 0x210   : > { %1139 = vst.msk [vmem:[%s2077_s25 + $0x60] sm:$0xff] %vm1126_vm6, %v1106_v57  ;;  %v1123_v8 = vsel %vm1052_vm2, %v1012_v50, %v1091_v56 }
 0x211   : > { %v1107_v58 = vsel %vm1036_vm3, %v948_v53, %v1075_v7  ;;  %1156 = vst.msk [vmem:[%s2077_s25 + $0xe8] sm:$0xff] %vm1126_vm6, %v1123_v8 }
 0x212   : > { %1140 = vst.msk [vmem:[%s2077_s25 + $0x68] sm:$0xff] %vm1126_vm6, %v1107_v58 }
 0x219   : > { %v1016_v59 = vpop.f32.mrb[28].mxu1  ;;  %v952_v60 = vpop.f32.mrb[28].mxu0 }
 0x21a   : > { %v1017_v61 = vadd.f32 %v2065_v26, %v1016_v59  ;;  %v1018_v62 = vpop.f32.mrb[29].mxu1  ;;  %v953_v63 = vadd.f32 %v2065_v26, %v952_v60  ;;  %v954_v0 = vpop.f32.mrb[29].mxu0 }
 0x21b   : > { %v1019_v9 = vpop.f32.mrb[30].mxu1  ;;  %v955_v2 = vpop.f32.mrb[30].mxu0 }
 0x21c   : > { %vm1053_vm4 = vcmp.ge.f32.partialorder %v1017_v61, 0.0  ;;  %v1092_v4 = vmul.f32 %v2070_v44, %v1017_v61  ;;  %v1020_v10 = vadd.f32 %v2065_v26, %v1019_v9  ;;  %v1021_v11 = vpop.f32.mrb[31].mxu1  ;;  %vm1037_vm5 = vcmp.ge.f32.partialorder %v953_v63, 0.0  ;;  %v957_v12 = vpop.f32.mrb[31].mxu0 }
 0x21d   : > { %v1076_v13 = vmul.f32 %v2070_v44, %v953_v63  ;;  %v956_v15 = vadd.f32 %v2065_v26, %v955_v2 }
 0x21e   : > { %v1124_v14 = vsel %vm1053_vm4, %v1017_v61, %v1092_v4  ;;  %vm1054_vm7 = vcmp.ge.f32.partialorder %v1020_v10, 0.0  ;;  %v1093_v16 = vmul.f32 %v2070_v44, %v1020_v10 }
 0x21f   : > { %v1108_v17 = vsel %vm1037_vm5, %v953_v63, %v1076_v13  ;;  %1157 = vst.msk [vmem:[%s2077_s25 + $0xf0] sm:$0xff] %vm1126_vm6, %v1124_v14  ;;  %vm1038_vm8 = vcmp.ge.f32.partialorder %v956_v15, 0.0  ;;  %v1077_v19 = vmul.f32 %v2070_v44, %v956_v15 }
 0x220   : > { %1141 = vst.msk [vmem:[%s2077_s25 + $0x70] sm:$0xff] %vm1126_vm6, %v1108_v17  ;;  %v1125_v21 = vsel %vm1054_vm7, %v1020_v10, %v1093_v16 }
 0x221   : > { %v1109_v22 = vsel %vm1038_vm8, %v956_v15, %v1077_v19  ;;  %1158 = vst.msk [vmem:[%s2077_s25 + $0xf8] sm:$0xff] %vm1126_vm6, %v1125_v21 }
 0x222   : > { %1142 = vst.msk [vmem:[%s2077_s25 + $0x78] sm:$0xff] %vm1126_vm6, %v1109_v22 }
 0x223 PF: > { %s18_s20 = sadd.s32 1, %s1599_s20   ;;  %s2240_s15 = smov %s1583_s16 }
 0x224   : > { %p15_p1 = scmp.ge.s32.totalorder %s18_s20, 4   ;;  %s2241_s16 = smov %s1587_s17 }
 0x225   : > { %s2242_s17 = smov %s1724_s26  ;;  %s2243_s18 = smov %s1595_s19 }
 0x226   : > { %s2244_s19 = smov %s2246_s28  ;;  %17 = sbr.rel (!%p15_p1) target bundleno = 5 (0x5), region = 80 }
 0x22d   :  { %1200 = vsyncpa [#allocation3], 1 }
 0x22e   :  { %1202 = vsyncpa [#allocation3 + $0x1], 1 }
 0x22f   :  { %1203 = vsyncpa [#allocation5], 1 }

// kernel: tpu_custom_call.1
= control target key start
LH: loop header
LB: loop body
LE: loop exit
PB: predicated region body
PF: predicated region fallthrough
CT: control target
= control target key end

     0   :  { %9 = vsyncpa [#allocation3], 0  ;;  %s2223_s0 = inlined_call_operand.hbm [shape: bf16[2,1,20,16,40], index: 0, kind: input, shape index: {}]   ;;  %s2224_s1 = inlined_call_operand.hbm [shape: bf16[200,128], index: 1, kind: input, shape index: {}]   ;;  %s2225_s2 = inlined_call_operand.vmem [shape: f32[1,128], index: 2, kind: input, shape index: {}]   ;;  %s2226_s3 = inlined_call_operand.vmem [shape: f32[1,128], index: 3, kind: input, shape index: {}]   ;;  %s2227_s4 = inlined_call_operand.vmem [shape: f32[2,16,16,8], index: 4, kind: output, shape index: {}]  }
   0x1   :  { %11 = vsyncpa [#allocation3 + $0x1], 0 }
   0x2   :  { %12 = vsyncpa [#allocation5], 0  ;;  %s1635_s15 = smov 0   ;;  %s1637_s16 = smov 0  }
   0x3   :  { %s1639_s17 = smov 0   ;;  %s1641_s18 = smov 0  }
   0x4   :  { %s1643_s19 = smov 0   ;;  %s1645_s20 = smov 0  }
   0x5 LB: > { %s1288_s21 = sadd.s32 4294967295, %s1599_s20   ;;  %p61_p0 = scmp.ne.s32.totalorder %s1583_s16, %s1579_s15  ;;  %s1599_s20 = sphi %s1645_s20, %s18_s20   ;;  %s1595_s19 = sphi %s1643_s19, %s2244_s19   ;;  %s1591_s18 = sphi %s1641_s18, %s2243_s18   ;;  %s1587_s17 = sphi %s1639_s17, %s2242_s17   ;;  %s1583_s16 = sphi %s1637_s16, %s2241_s16   ;;  %s1579_s15 = sphi %s1635_s15, %s2240_s15  }
   0x6   : > { %p1665_p1 = scmp.eq.s32.totalorder %s1288_s21, 0  ;;  %p1290_p2 = scmp.ge.s32.totalorder %s1599_s20, 1 }
   0x7   : > { %p165_p3 = scmp.lt.s32.totalorder %s1599_s20, 3  ;;  %s1601_s25 = smov [#allocation4]  }
   0x8   : > { %s2232_s22 = scalar_select %p1665_p1, 1, 0 }
   0x9   : > { %p1673_p4 = por %p1665_p1, %p61_p0  ;;  %p1677_p5 = pnand %p1290_p2, %p165_p3 }
   0xa   : > { %s177_s26 = sshll.u32 %s1601_s25, 4  ;;  %s37_s28 = sadd.s32 1, %s1595_s19  ;;  %s178_s26 = int_to_ptr.vmem [resolvable:$true] %s177_s26 }
   0xb   : > { %s2233_s23 = scalar_select %p1673_p4, 1, 0 }
   0xc   : > { %s2234_s24 = scalar_select %p1677_p5, 1, 0 }
   0xd   : > { %p1387_p6 = pneg %p1677_p5  ;;  %s1487_s5 = scalar_lea.hbm %s2224_s1, 1600 }
   0xe   : > { %p1488_p8 = scmp.ne.s32.totalorder %s2224_s1, %s1487_s5  ;;  %p1494_p12 = scmp.lt.u32.totalorder %s1487_s5, %s2224_s1 }
   0xf   : > { %p1685_p7 = pnand %p1387_p6, %p1665_p1 }
  0x11   : > { %p1489_p9 = pneg %p1685_p7 }
  0x13   : > { %p1490_p10 = pnand %p1489_p9, %p1488_p8 }
  0x15   : > { %p1491_p11 = pneg %p1490_p10 }
  0x17   : > { %p1496_p13 = pnand %p1494_p12, %p1491_p11 }
  0x19   : > { %1499 = shalt.err (!%p1496_p13)
}
  0x1a   : > { %s1500_s10 = scalar_lea.vmem %s178_s26, 1600  ;;  %p1508_p6 = scmp.lt.s32.totalorder %s178_s26, %s178_s26 }
  0x1b   : > { %p1501_p0 = scmp.ne.s32.totalorder %s178_s26, %s1500_s10  ;;  %p1509_p1 = scmp.lt.s32.totalorder %s1500_s10, %s1500_s10 }
  0x1d   : > { %p1503_p2 = pnand %p1501_p0, %p1489_p9  ;;  %p1510_p4 = por %p1509_p1, %p1508_p6 }
  0x1f   : > { %p1504_p3 = pneg %p1503_p2 }
  0x21   : > { %p1511_p5 = pnand %p1510_p4, %p1504_p3 }
  0x23   : > { %1514 = shalt.err (!%p1511_p5)
}
  0x24   : > { %s1602_s11 = smov 64   ;;  %s1603_s12 = smov 4  }
  0x25   : > { %1390 = dma.hbm_to_vmem [thread:$0]  (!%p1685_p7), %s2224_s1, 1600, %s178_s26, [#allocation5], %s1602_s11, %s1602_s11, %s1603_s12  }
  0x26   : > { %p39_p1 = scmp.ge.s32.totalorder %s37_s28, 2  ;;  %s48_s15 = sadd.s32 1, %s1587_s17 }
  0x27   : > { %p55_p4 = scmp.ne.s32.totalorder %s1587_s17, %s1583_s16  ;;  %p56_p5 = scmp.eq.s32.totalorder %s1599_s20, 0 }
  0x28   : > { %s2246_s28 = smov (%p39_p1, %s37_s28), 0  ;;  %p1396_p9 = scmp.lt.s32.totalorder %s1599_s20, 2 }
  0x29   : > { %p57_p8 = por %p56_p5, %p55_p4  ;;  %s41_s21 = ssub.s32 %s1595_s19, %s2246_s28 }
  0x2a   : > { %s197_s25 = sand.u32 1, %s1587_s17   ;;  %p46_p10 = scmp.eq.s32.totalorder %s41_s21, 0 }
  0x2b   : > { %s1378_s27 = smul.u32 160, %s197_s25  ;;  %p1719_p11 = pnand %p1396_p9, %p57_p8 }
  0x2c   : > { %s1724_s26 = scalar_select %p46_p10, %s1587_s17, %s48_s15  }
  0x2d   : > { %s1379_s30 = smul.u32 2560, %s1595_s19  ;;  %s201_s5 = scalar_lea.vmem [#allocation2], %s1378_s27 }
  0x2e   : > { %s212_s6 = sshll.u32 %s201_s5, 4  ;;  %s1734_s10 = scalar_lea.sflag [#allocation3], %s197_s25  ;;  %s1732_s6 = int_to_ptr.vmem [resolvable:$true] %s212_s6 }
  0x2f   : > { %s1730_s9 = scalar_lea.hbm %s2223_s0, %s1379_s30  ;;  %p1517_p12 = pneg %p1719_p11 }
  0x30   : > { %s1515_s13 = scalar_lea.hbm %s1730_s9, 2560  ;;  %s1520_s21 = scalar_lea.hbm %s2223_s0, 5120 }
  0x31   : > { %p1516_p7 = scmp.ne.s32.totalorder %s1730_s9, %s1515_s13  ;;  %p1521_p2 = scmp.lt.u32.totalorder %s1730_s9, %s2223_s0 }
  0x32   : > { %p1522_p3 = scmp.lt.u32.totalorder %s1520_s21, %s1515_s13  ;;  %p1524_p1 = scmp.lt.u32.totalorder %s1515_s13, %s1730_s9 }
  0x33   : > { %p1518_p13 = pnand %p1517_p12, %p1516_p7 }
  0x34   : > { %p1523_p6 = por %p1522_p3, %p1521_p2 }
  0x35   : > { %p1519_p0 = pneg %p1518_p13 }
  0x36   : > { %p1525_p4 = por %p1524_p1, %p1523_p6 }
  0x38   : > { %p1526_p5 = pnand %p1525_p4, %p1519_p0 }
  0x3a   : > { %1529 = shalt.err (!%p1526_p5)
}
  0x3b   : > { %s1530_s25 = scalar_lea.vmem %s1732_s6, 2560  ;;  %s1604_s5 = smov [#allocation2]  }
  0x3c   : > { %p1531_p8 = scmp.ne.s32.totalorder %s1732_s6, %s1530_s25  ;;  %s1535_s7 = sshll.u32 %s1604_s5, 4  ;;  %s1536_s7 = int_to_ptr.vmem [resolvable:$false] %s1535_s7 }
  0x3d   : > { %s1537_s8 = scalar_lea.vmem %s1536_s7, 5120  ;;  %p1538_p7 = scmp.lt.s32.totalorder %s1732_s6, %s1536_s7 }
  0x3e   : > { %p1533_p9 = pnand %p1531_p8, %p1517_p12  ;;  %p1539_p13 = scmp.lt.s32.totalorder %s1537_s8, %s1530_s25 }
  0x40   : > { %p1534_p10 = pneg %p1533_p9  ;;  %p1540_p2 = por %p1539_p13, %p1538_p7 }
  0x42   : > { %p1541_p3 = pnand %p1540_p2, %p1534_p10 }
  0x44   : > { %1544 = shalt.err (!%p1541_p3)
}
  0x45   : > { %1394 = dma.hbm_to_vmem [thread:$0]  (!%p1719_p11), %s1730_s9, 2560, %s1732_s6, %s1734_s10, %s1602_s11, %s1602_s11, %s1603_s12  }
  0x46   : > { %p2237_p12 = scmp.ne.s32.totalorder %s2234_s24, 0 }
  0x47   : > { %s226_s13 = sand.u32 (!%p2237_p12), 1, %s1583_s16   ;;  %p2238_p0 = scmp.ne.s32.totalorder (!%p2237_p12), %s2233_s23, 0 }
  0x48   : > { %224 = sbr.rel (%p2237_p12) target bundleno = 547 (0x223), region = 36  ;;  %s227_s15 = scalar_lea.sflag (!%p2237_p12), [#allocation3], %s226_s13 }
  0x49   : > { %s1380_s14 = smul.u32 (!%p2237_p12), 160, %s226_s13 }
  0x4b   : > { %s1768_s21 = scalar_lea.vmem (!%p2237_p12), [#allocation2], %s1380_s14 }
  0x4f   : > { %1570 = dma.done.wait (%p2238_p0), %s227_s15, 2560  }
  0x50   : > { %1572 = vsyncadd (%p2238_p0), %s227_s15, 4294964736  ;;  %p2239_p6 = scmp.ne.s32.totalorder %s2232_s22, 0 }
  0x52   : > { %1574 = dma.done.wait (%p2239_p6), [#allocation5], 1600  }
  0x53   : > { %1576 = vsyncadd (%p2239_p6), [#allocation5], 4294965696  ;;  %v1605_v0 = vmov 0   ;;  %v1781_v1 = vld [vmem:[%s1768_s21 + $0x10] sm:$0xff]   ;;  %v1784_v2 = vld [vmem:[%s1768_s21 + $0x8] sm:$0xff]   ;;  %s1606_s23 = smov 80  }
  0x54   : > { %862 = vmatprep.subr.bf16.mxu0 %v1605_v0  ;;  %1352 = vmatprep.subr.bf16.mxu1 %v1605_v0  ;;  %v1789_v3 = vld [vmem:[%s1768_s21 + $0x50] sm:$0xff]   ;;  %s1607_s22 = smov 40   ;;  %v1794_v4 = vld [vmem:[%s1768_s21 + $0x48] sm:$0xff]   ;;  %v1799_v5 = vld [vmem:[%s1768_s21 + $0x58] sm:$0xff]   ;;  %s1608_s24 = smov 120   ;;  %vm858_vm0 = vcmask 1043456  }
  0x55   : > { %448 = vrot.lane.b32.xlu1 %v1781_v1, %s1606_s23  ;;  %411 = vrot.lane.b32.xlu0 %v1784_v2, %s1607_s22  ;;  %v1804_v6 = vld [vmem:[%s1768_s21 + $0x18] sm:$0xff]   ;;  %v1809_v7 = vld [vmem:[%s1768_s21 + $0x60] sm:$0xff]   ;;  %s1609_s11 = smov 32   ;;  %v1471_v10 = vld [vmem:[#allocation4 + $0x8] sm:$0xff]   ;;  %vm554_vm1 = vcmask 326656   ;;  %vm685_vm2 = vcmask 261120  }
  0x56   : > { %v1814_v8 = vld [vmem:[%s1768_s21 + $0x20] sm:$0xff]   ;;  %v1472_v11 = vld [vmem:[#allocation4 + $0x10] sm:$0xff]   ;;  %v1833_v12 = vld [vmem:[%s1768_s21 + $0x68] sm:$0xff]   ;;  %vm825_vm3 = vcmask 588800   ;;  %vm603_vm4 = vcmask 654336   ;;  %vm636_vm5 = vcmask 982016  }
  0x57   : > { %v1470_v9 = vld [vmem:[#allocation4] sm:$0xff]   ;;  %v1473_v13 = vld [vmem:[#allocation4 + $0x18] sm:$0xff]   ;;  %v1840_v14 = vld [vmem:[%s1768_s21 + $0x28] sm:$0xff]   ;;  %p271_p11 = scmp.lt.s32.totalorder %s1591_s18, 1  ;;  %vm1126_vm6 = vcmask 64512  }
  0x58   : > { %863 = vmatpush1.bf16.msra.mxu0 %v1470_v9  ;;  %1365 = vmatpush1.bf16.msra.mxu1 %v1470_v9  ;;  %v1475_v15 = vld [vmem:[#allocation4 + $0x20] sm:$0xff]   ;;  %v1476_v16 = vld [vmem:[#allocation4 + $0x28] sm:$0xff]   ;;  %v1477_v17 = vld [vmem:[#allocation4 + $0x30] sm:$0xff]  }
  0x59   : > { %464 = vrot.lane.b32.xlu1 %v1789_v3, %s1606_s23  ;;  %427 = vrot.lane.b32.xlu0 %v1794_v4, %s1607_s22  ;;  %v1865_v18 = vld [vmem:[%s1768_s21 + $0x70] sm:$0xff]   ;;  %v1478_v19 = vld [vmem:[#allocation4 + $0x38] sm:$0xff]   ;;  %v1480_v21 = vld [vmem:[#allocation4 + $0x40] sm:$0xff]   ;;  %s2248_s18 = smov (!%p271_p11, %s1591_s18), 1 }
  0x5a   : > { %864 = vmatprep.subr.bf16.mxu0 %v1605_v0  ;;  %1353 = vmatprep.subr.bf16.mxu1 %v1605_v0  ;;  %v1870_v20 = vld [vmem:[%s1768_s21 + $0x30] sm:$0xff]   ;;  %v1481_v22 = vld [vmem:[#allocation4 + $0x48] sm:$0xff]   ;;  %v1895_v24 = vld [vmem:[%s1768_s21 + $0x78] sm:$0xff]   ;;  %s1351_s6 = sshll.u32 %s2248_s18, 8 }
  0x5b   : > { %v1483_v23 = vld [vmem:[#allocation4 + $0x50] sm:$0xff]   ;;  %v1484_v25 = vld [vmem:[#allocation4 + $0x58] sm:$0xff]   ;;  %v1486_v27 = vld [vmem:[#allocation4 + $0x60] ss:$0 sps:$4 sm:$0xff]   ;;  %s2077_s25 = scalar_lea.vmem %s2227_s4, %s1351_s6 }
  0x5c   : > { %865 = vmatpush1.bf16.msra.mxu0 %v1471_v10  ;;  %1366 = vmatpush1.bf16.msra.mxu1 %v1471_v10  ;;  %v1900_v26 = vld [vmem:[%s1768_s21 + $0x38] sm:$0xff]   ;;  %v860_v28 = vsel %vm858_vm0, %v1486_v27, 0  ;;  %v1468_v29 = vld [vmem:[%s1768_s21 + $0x80] sm:$0xff]   ;;  %v1474_v31 = vld [vmem:[%s1768_s21 + $0x88] sm:$0xff]  }
  0x5d   : > { %501 = vrot.lane.b32.xlu1 %v1799_v5, %s1608_s24  ;;  %485 = vrot.lane.b32.xlu0 %v1804_v6, %s1608_s24  ;;  %v1469_v30 = vld [vmem:[%s1768_s21 + $0x40] sm:$0xff]   ;;  %v1479_v32 = vld [vmem:[%s1768_s21 + $0x90] sm:$0xff]  }
  0x5e   : > { %866 = vmatprep.subr.bf16.mxu0 %v1605_v0  ;;  %1354 = vmatprep.subr.bf16.mxu1 %v1605_v0  ;;  %v1485_v37 = vld [vmem:[%s1768_s21 + $0x98] sm:$0xff]   ;;  %v1482_v38 = vld [vmem:[%s1768_s21] sm:$0xff]  }
  0x60   : > { %867 = vmatpush1.bf16.msra.mxu0 %v1472_v11  ;;  %1367 = vmatpush1.bf16.msra.mxu1 %v1472_v11 }
  0x61   : > { %538 = vrot.lane.b32.xlu1 %v1809_v7, %s1609_s11  ;;  %522 = vrot.lane.b32.xlu0 %v1814_v8, %s1609_s11 }
  0x62   : > { %868 = vmatprep.subr.bf16.mxu0 %v1605_v0  ;;  %1355 = vmatprep.subr.bf16.mxu1 %v1605_v0 }
  0x64   : > { %869 = vmatpush1.bf16.msra.mxu0 %v1473_v13  ;;  %1368 = vmatpush1.bf16.msra.mxu1 %v1473_v13 }
  0x65   : > { %429 = vrot.lane.b32.xlu1 %v1789_v3, %s1607_s22  ;;  %413 = vrot.lane.b32.xlu0 %v1781_v1, %s1607_s22 }
  0x66   : > { %870 = vmatprep.subr.bf16.mxu0 %v1605_v0  ;;  %1356 = vmatprep.subr.bf16.mxu1 %v1605_v0 }
  0x68   : > { %871 = vmatpush1.bf16.msra.mxu0 %v1475_v15  ;;  %1369 = vmatpush1.bf16.msra.mxu1 %v1475_v15 }
  0x69   : > { %466 = vrot.lane.b32.xlu1 %v1799_v5, %s1606_s23  ;;  %450 = vrot.lane.b32.xlu0 %v1804_v6, %s1606_s23 }
  0x6a   : > { %872 = vmatprep.subr.bf16.mxu0 %v1605_v0  ;;  %1357 = vmatprep.subr.bf16.mxu1 %v1605_v0 }
  0x6c   : > { %873 = vmatpush1.bf16.msra.mxu0 %v1476_v16  ;;  %1370 = vmatpush1.bf16.msra.mxu1 %v1476_v16 }
  0x6d   : > { %503 = vrot.lane.b32.xlu1 %v1809_v7, %s1608_s24  ;;  %487 = vrot.lane.b32.xlu0 %v1814_v8, %s1608_s24 }
  0x6e   : > { %874 = vmatprep.subr.bf16.mxu0 %v1605_v0  ;;  %1358 = vmatprep.subr.bf16.mxu1 %v1605_v0 }
  0x70   : > { %875 = vmatpush1.bf16.msra.mxu0 %v1477_v17  ;;  %1371 = vmatpush1.bf16.msra.mxu1 %v1477_v17 }
  0x71   : > { %540 = vrot.lane.b32.xlu1 %v1833_v12, %s1609_s11  ;;  %524 = vrot.lane.b32.xlu0 %v1840_v14, %s1609_s11 }
  0x72   : > { %876 = vmatprep.subr.bf16.mxu0 %v1605_v0  ;;  %1359 = vmatprep.subr.bf16.mxu1 %v1605_v0 }
  0x74   : > { %877 = vmatpush1.bf16.msra.mxu0 %v1478_v19  ;;  %1372 = vmatpush1.bf16.msra.mxu1 %v1478_v19 }
  0x75   : > { %431 = vrot.lane.b32.xlu1 %v1799_v5, %s1607_s22  ;;  %415 = vrot.lane.b32.xlu0 %v1804_v6, %s1607_s22 }
  0x76   : > { %878 = vmatprep.subr.bf16.mxu0 %v1605_v0  ;;  %1360 = vmatprep.subr.bf16.mxu1 %v1605_v0 }
  0x78   : > { %879 = vmatpush1.bf16.msra.mxu0 %v1480_v21  ;;  %1373 = vmatpush1.bf16.msra.mxu1 %v1480_v21 }
  0x79   : > { %468 = vrot.lane.b32.xlu1 %v1809_v7, %s1606_s23  ;;  %452 = vrot.lane.b32.xlu0 %v1814_v8, %s1606_s23 }
  0x7a   : > { %880 = vmatprep.subr.bf16.mxu0 %v1605_v0  ;;  %1361 = vmatprep.subr.bf16.mxu1 %v1605_v0 }
  0x7c   : > { %881 = vmatpush1.bf16.msra.mxu0 %v1481_v22  ;;  %1374 = vmatpush1.bf16.msra.mxu1 %v1481_v22 }
  0x7d   : > { %505 = vrot.lane.b32.xlu1 %v1833_v12, %s1608_s24  ;;  %489 = vrot.lane.b32.xlu0 %v1840_v14, %s1608_s24 }
  0x7e   : > { %882 = vmatprep.subr.bf16.mxu0 %v1605_v0  ;;  %1362 = vmatprep.subr.bf16.mxu1 %v1605_v0 }
  0x80   : > { %883 = vmatpush1.bf16.msra.mxu0 %v1483_v23  ;;  %1375 = vmatpush1.bf16.msra.mxu1 %v1483_v23 }
  0x81   : > { %542 = vrot.lane.b32.xlu1 %v1865_v18, %s1609_s11  ;;  %526 = vrot.lane.b32.xlu0 %v1870_v20, %s1609_s11 }
  0x82   : > { %884 = vmatprep.subr.bf16.mxu0 %v1605_v0  ;;  %1363 = vmatprep.subr.bf16.mxu1 %v1605_v0 }
  0x84   : > { %885 = vmatpush1.bf16.msra.mxu0 %v1484_v25  ;;  %1376 = vmatpush1.bf16.msra.mxu1 %v1484_v25 }
  0x85   : > { %433 = vrot.lane.b32.xlu1 %v1809_v7, %s1607_s22  ;;  %417 = vrot.lane.b32.xlu0 %v1814_v8, %s1607_s22 }
  0x86   : > { %886 = vmatprep.subr.bf16.mxu0 %v1605_v0  ;;  %1364 = vmatprep.subr.bf16.mxu1 %v1605_v0 }
  0x88   : > { %887 = vmatpush1.bf16.msra.mxu0 %v860_v28  ;;  %1377 = vmatpush1.bf16.msra.mxu1 %v860_v28 }
  0x89   : > { %470 = vrot.lane.b32.xlu1 %v1833_v12, %s1606_s23  ;;  %454 = vrot.lane.b32.xlu0 %v1840_v14, %s1606_s23 }
  0x8d   : > { %507 = vrot.lane.b32.xlu1 %v1865_v18, %s1608_s24  ;;  %491 = vrot.lane.b32.xlu0 %v1870_v20, %s1608_s24 }
  0x91   : > { %544 = vrot.lane.b32.xlu1 %v1895_v24, %s1609_s11  ;;  %528 = vrot.lane.b32.xlu0 %v1900_v26, %s1609_s11 }
  0x95   : > { %435 = vrot.lane.b32.xlu1 %v1833_v12, %s1607_s22  ;;  %419 = vrot.lane.b32.xlu0 %v1840_v14, %s1607_s22 }
  0x99   : > { %472 = vrot.lane.b32.xlu1 %v1865_v18, %s1606_s23  ;;  %456 = vrot.lane.b32.xlu0 %v1870_v20, %s1606_s23 }
  0x9d   : > { %509 = vrot.lane.b32.xlu1 %v1895_v24, %s1608_s24  ;;  %493 = vrot.lane.b32.xlu0 %v1900_v26, %s1608_s24 }
  0xa1   : > { %546 = vrot.lane.b32.xlu1 %v1468_v29, %s1609_s11  ;;  %530 = vrot.lane.b32.xlu0 %v1469_v30, %s1609_s11 }
  0xa5   : > { %437 = vrot.lane.b32.xlu1 %v1865_v18, %s1607_s22  ;;  %421 = vrot.lane.b32.xlu0 %v1870_v20, %s1607_s22 }
  0xa9   : > { %474 = vrot.lane.b32.xlu1 %v1895_v24, %s1606_s23  ;;  %458 = vrot.lane.b32.xlu0 %v1900_v26, %s1606_s23 }
  0xad   : > { %511 = vrot.lane.b32.xlu1 %v1468_v29, %s1608_s24  ;;  %495 = vrot.lane.b32.xlu0 %v1469_v30, %s1608_s24 }
  0xb1   : > { %548 = vrot.lane.b32.xlu1 %v1474_v31, %s1609_s11  ;;  %532 = vrot.lane.b32.xlu0 %v1794_v4, %s1609_s11 }
  0xb5   : > { %439 = vrot.lane.b32.xlu1 %v1895_v24, %s1607_s22  ;;  %423 = vrot.lane.b32.xlu0 %v1900_v26, %s1607_s22 }
  0xb9   : > { %476 = vrot.lane.b32.xlu1 %v1468_v29, %s1606_s23  ;;  %460 = vrot.lane.b32.xlu0 %v1469_v30, %s1606_s23 }
  0xbd   : > { %513 = vrot.lane.b32.xlu1 %v1474_v31, %s1608_s24  ;;  %497 = vrot.lane.b32.xlu0 %v1794_v4, %s1608_s24 }
  0xc1   : > { %550 = vrot.lane.b32.xlu1 %v1479_v32, %s1609_s11  ;;  %534 = vrot.lane.b32.xlu0 %v1789_v3, %s1609_s11 }
  0xc5   : > { %441 = vrot.lane.b32.xlu1 %v1468_v29, %s1607_s22  ;;  %425 = vrot.lane.b32.xlu0 %v1469_v30, %s1607_s22 }
  0xc7   : > { %v449_v33 = vpop.permute.xlu1 %448  ;;  %v412_v34 = vpop.permute.xlu0 %411 }
  0xc8   : > { %v557_v42 = vsel %vm554_vm1, %v1482_v38, %v412_v34 }
  0xc9   : > { %478 = vrot.lane.b32.xlu1 %v1474_v31, %s1606_s23  ;;  %462 = vrot.lane.b32.xlu0 %v1794_v4, %s1606_s23  ;;  %v605_v48 = vsel %vm603_vm4, %v557_v42, %v449_v33 }
  0xcb   : > { %v465_v35 = vpop.permute.xlu1 %464  ;;  %v428_v36 = vpop.permute.xlu0 %427 }
  0xcc   : > { %v581_v41 = vsel %vm554_vm1, %v1469_v30, %v428_v36 }
  0xcd   : > { %515 = vrot.lane.b32.xlu1 %v1479_v32, %s1608_s24  ;;  %499 = vrot.lane.b32.xlu0 %v1789_v3, %s1608_s24  ;;  %v621_v46 = vsel %vm603_vm4, %v581_v41, %v465_v35 }
  0xcf   : > { %v502_v39 = vpop.permute.xlu1 %501  ;;  %v486_v40 = vpop.permute.xlu0 %485 }
  0xd0   : > { %v662_v49 = vsel %vm636_vm5, %v621_v46, %v502_v39  ;;  %v638_v50 = vsel %vm636_vm5, %v605_v48, %v486_v40 }
  0xd1   : > { %552 = vrot.lane.b32.xlu1 %v1485_v37, %s1609_s11  ;;  %536 = vrot.lane.b32.xlu0 %v1799_v5, %s1609_s11 }
  0xd3   : > { %v539_v43 = vpop.permute.xlu1 %538  ;;  %v523_v44 = vpop.permute.xlu0 %522 }
  0xd4   : > { %v703_v45 = vsel %vm685_vm2, %v502_v39, %v539_v43  ;;  %v687_v47 = vsel %vm685_vm2, %v486_v40, %v523_v44 }
  0xd5   : > { %1340 = vmatprep.mubr.msk.bf16.mxu1 %vm825_vm3, %v703_v45  ;;  %1332 = vmatprep.mubr.msk.bf16.mxu0 %vm825_vm3, %v687_v47 }
  0xd6   : > { %959 = vmatmul.mubr.bf16.vlgmr.msra.gmra.mrb[0].mxu1 %v662_v49  ;;  %895 = vmatmul.mubr.bf16.vlgmr.msra.gmra.mrb[0].mxu0 %v638_v50 }
  0xd7   : > { %v430_v51 = vpop.permute.xlu1 %429  ;;  %v414_v52 = vpop.permute.xlu0 %413 }
  0xd8   : > { %v584_v57 = vsel %vm554_vm1, %v1794_v4, %v430_v51  ;;  %v560_v59 = vsel %vm554_vm1, %v1784_v2, %v414_v52 }
  0xdb   : > { %v467_v53 = vpop.permute.xlu1 %466  ;;  %v451_v54 = vpop.permute.xlu0 %450 }
  0xdc   : > { %v623_v60 = vsel %vm603_vm4, %v584_v57, %v467_v53  ;;  %v607_v63 = vsel %vm603_vm4, %v560_v59, %v451_v54 }
  0xdf   : > { %v504_v55 = vpop.permute.xlu1 %503  ;;  %v488_v56 = vpop.permute.xlu0 %487 }
  0xe0   : > { %v665_v9 = vsel %vm636_vm5, %v623_v60, %v504_v55  ;;  %v641_v4 = vsel %vm636_vm5, %v607_v63, %v488_v56 }
  0xe3   : > { %v541_v58 = vpop.permute.xlu1 %540  ;;  %v525_v62 = vpop.permute.xlu0 %524 }
  0xe4   : > { %v705_v61 = vsel %vm685_vm2, %v504_v55, %v541_v58  ;;  %v689_v0 = vsel %vm685_vm2, %v488_v56, %v525_v62 }
  0xe5   : > { %1341 = vmatprep.mubr.msk.bf16.mxu1 %vm825_vm3, %v705_v61  ;;  %1333 = vmatprep.mubr.msk.bf16.mxu0 %vm825_vm3, %v689_v0 }
  0xe6   : > { %967 = vmatmul.mubr.bf16.gmra.mrb[4].mxu1 %v665_v9  ;;  %903 = vmatmul.mubr.bf16.gmra.mrb[4].mxu0 %v641_v4 }
  0xe7   : > { %v432_v2 = vpop.permute.xlu1 %431  ;;  %v416_v10 = vpop.permute.xlu0 %415 }
  0xe8   : > { %v587_v17 = vsel %vm554_vm1, %v1789_v3, %v432_v2  ;;  %v563_v21 = vsel %vm554_vm1, %v1781_v1, %v416_v10 }
  0xeb   : > { %v469_v11 = vpop.permute.xlu1 %468  ;;  %v453_v13 = vpop.permute.xlu0 %452 }
  0xec   : > { %v625_v22 = vsel %vm603_vm4, %v587_v17, %v469_v11  ;;  %v609_v27 = vsel %vm603_vm4, %v563_v21, %v453_v13 }
  0xef   : > { %v506_v15 = vpop.permute.xlu1 %505  ;;  %v490_v16 = vpop.permute.xlu0 %489 }
  0xf0   : > { %v668_v29 = vsel %vm636_vm5, %v625_v22, %v506_v15  ;;  %v644_v3 = vsel %vm636_vm5, %v609_v27, %v490_v16 }
  0xf3   : > { %v543_v19 = vpop.permute.xlu1 %542  ;;  %v527_v25 = vpop.permute.xlu0 %526 }
  0xf4   : > { %v707_v23 = vsel %vm685_vm2, %v506_v15, %v543_v19  ;;  %v691_v28 = vsel %vm685_vm2, %v490_v16, %v527_v25 }
  0xf5   : > { %1342 = vmatprep.mubr.msk.bf16.mxu1 %vm825_vm3, %v707_v23  ;;  %1334 = vmatprep.mubr.msk.bf16.mxu0 %vm825_vm3, %v691_v28 }
  0xf6   : > { %975 = vmatmul.mubr.bf16.gmra.mrb[8].mxu1 %v668_v29  ;;  %911 = vmatmul.mubr.bf16.gmra.mrb[8].mxu0 %v644_v3 }
  0xf7   : > { %v434_v1 = vpop.permute.xlu1 %433  ;;  %v418_v30 = vpop.permute.xlu0 %417 }
  0xf8   : > { %v590_v35 = vsel %vm554_vm1, %v1799_v5, %v434_v1  ;;  %v566_v37 = vsel %vm554_vm1, %v1804_v6, %v418_v30 }
  0xfb   : > { %v471_v31 = vpop.permute.xlu1 %470  ;;  %v455_v32 = vpop.permute.xlu0 %454 }
  0xfc   : > { %v627_v38 = vsel %vm603_vm4, %v590_v35, %v471_v31  ;;  %v611_v41 = vsel %vm603_vm4, %v566_v37, %v455_v32 }
  0xff   : > { %v508_v33 = vpop.permute.xlu1 %507  ;;  %v492_v34 = vpop.permute.xlu0 %491 }
 0x100   : > { %v671_v43 = vsel %vm636_vm5, %v627_v38, %v508_v33  ;;  %v647_v5 = vsel %vm636_vm5, %v611_v41, %v492_v34 }
 0x103   : > { %v545_v36 = vpop.permute.xlu1 %544  ;;  %v529_v40 = vpop.permute.xlu0 %528 }
 0x104   : > { %v709_v39 = vsel %vm685_vm2, %v508_v33, %v545_v36  ;;  %v693_v42 = vsel %vm685_vm2, %v492_v34, %v529_v40 }
 0x105   : > { %1343 = vmatprep.mubr.msk.bf16.mxu1 %vm825_vm3, %v709_v39  ;;  %1335 = vmatprep.mubr.msk.bf16.mxu0 %vm825_vm3, %v693_v42 }
 0x106   : > { %983 = vmatmul.mubr.bf16.gmra.mrb[12].mxu1 %v671_v43  ;;  %919 = vmatmul.mubr.bf16.gmra.mrb[12].mxu0 %v647_v5 }
 0x107   : > { %v436_v6 = vpop.permute.xlu1 %435  ;;  %v420_v44 = vpop.permute.xlu0 %419 }
 0x108   : > { %v593_v49 = vsel %vm554_vm1, %v1809_v7, %v436_v6  ;;  %v569_v51 = vsel %vm554_vm1, %v1814_v8, %v420_v44  ;;  %v2070_v44 = vld [vmem:[%s2226_s3] ss:$0 sm:$0xff] }
 0x10b   : > { %v473_v45 = vpop.permute.xlu1 %472  ;;  %v457_v46 = vpop.permute.xlu0 %456 }
 0x10c   : > { %v629_v52 = vsel %vm603_vm4, %v593_v49, %v473_v45  ;;  %v613_v55 = vsel %vm603_vm4, %v569_v51, %v457_v46 }
 0x10f   : > { %v510_v47 = vpop.permute.xlu1 %509  ;;  %v494_v48 = vpop.permute.xlu0 %493 }
 0x110   : > { %v674_v57 = vsel %vm636_vm5, %v629_v52, %v510_v47  ;;  %v650_v7 = vsel %vm636_vm5, %v613_v55, %v494_v48 }
 0x113   : > { %v547_v50 = vpop.permute.xlu1 %546  ;;  %v531_v54 = vpop.permute.xlu0 %530 }
 0x114   : > { %v711_v53 = vsel %vm685_vm2, %v510_v47, %v547_v50  ;;  %v695_v56 = vsel %vm685_vm2, %v494_v48, %v531_v54 }
 0x115   : > { %1344 = vmatprep.mubr.msk.bf16.mxu1 %vm825_vm3, %v711_v53  ;;  %1336 = vmatprep.mubr.msk.bf16.mxu0 %vm825_vm3, %v695_v56 }
 0x116   : > { %991 = vmatmul.mubr.bf16.gmra.mrb[16].mxu1 %v674_v57  ;;  %927 = vmatmul.mubr.bf16.gmra.mrb[16].mxu0 %v650_v7 }
 0x117   : > { %v438_v8 = vpop.permute.xlu1 %437  ;;  %v422_v58 = vpop.permute.xlu0 %421 }
 0x118   : > { %v596_v63 = vsel %vm554_vm1, %v1833_v12, %v438_v8  ;;  %v572_v9 = vsel %vm554_vm1, %v1840_v14, %v422_v58 }
 0x11b   : > { %v475_v59 = vpop.permute.xlu1 %474  ;;  %v459_v60 = vpop.permute.xlu0 %458 }
 0x11c   : > { %v631_v4 = vsel %vm603_vm4, %v596_v63, %v475_v59  ;;  %v615_v11 = vsel %vm603_vm4, %v572_v9, %v459_v60 }
 0x11f   : > { %v512_v61 = vpop.permute.xlu1 %511  ;;  %v496_v62 = vpop.permute.xlu0 %495 }
 0x120   : > { %v677_v15 = vsel %vm636_vm5, %v631_v4, %v512_v61  ;;  %v653_v12 = vsel %vm636_vm5, %v615_v11, %v496_v62 }
 0x123   : > { %v549_v0 = vpop.permute.xlu1 %548  ;;  %v533_v10 = vpop.permute.xlu0 %532 }
 0x124   : > { %v713_v2 = vsel %vm685_vm2, %v512_v61, %v549_v0  ;;  %v697_v13 = vsel %vm685_vm2, %v496_v62, %v533_v10 }
 0x125   : > { %1345 = vmatprep.mubr.msk.bf16.mxu1 %vm825_vm3, %v713_v2  ;;  %1337 = vmatprep.mubr.msk.bf16.mxu0 %vm825_vm3, %v697_v13 }
 0x126   : > { %999 = vmatmul.mubr.bf16.gmra.mrb[20].mxu1 %v677_v15  ;;  %935 = vmatmul.mubr.bf16.gmra.mrb[20].mxu0 %v653_v12 }
 0x127   : > { %v440_v14 = vpop.permute.xlu1 %439  ;;  %v424_v16 = vpop.permute.xlu0 %423 }
 0x128   : > { %v599_v23 = vsel %vm554_vm1, %v1865_v18, %v440_v14  ;;  %v575_v27 = vsel %vm554_vm1, %v1870_v20, %v424_v16 }
 0x12b   : > { %v477_v17 = vpop.permute.xlu1 %476  ;;  %v461_v19 = vpop.permute.xlu0 %460 }
 0x12c   : > { %v633_v28 = vsel %vm603_vm4, %v599_v23, %v477_v17  ;;  %v617_v1 = vsel %vm603_vm4, %v575_v27, %v461_v19 }
 0x12f   : > { %v514_v21 = vpop.permute.xlu1 %513  ;;  %v498_v22 = vpop.permute.xlu0 %497 }
 0x130   : > { %v680_v31 = vsel %vm636_vm5, %v633_v28, %v514_v21  ;;  %v656_v18 = vsel %vm636_vm5, %v617_v1, %v498_v22 }
 0x133   : > { %v551_v25 = vpop.permute.xlu1 %550  ;;  %v535_v3 = vpop.permute.xlu0 %534 }
 0x134   : > { %v715_v29 = vsel %vm685_vm2, %v514_v21, %v551_v25  ;;  %v699_v30 = vsel %vm685_vm2, %v498_v22, %v535_v3 }
 0x135   : > { %1346 = vmatprep.mubr.msk.bf16.mxu1 %vm825_vm3, %v715_v29  ;;  %1338 = vmatprep.mubr.msk.bf16.mxu0 %vm825_vm3, %v699_v30 }
 0x136   : > { %1007 = vmatmul.mubr.bf16.gmra.mrb[24].mxu1 %v680_v31  ;;  %943 = vmatmul.mubr.bf16.gmra.mrb[24].mxu0 %v656_v18 }
 0x137   : > { %v442_v20 = vpop.permute.xlu1 %441  ;;  %v426_v32 = vpop.permute.xlu0 %425 }
 0x138   : > { %v602_v37 = vsel %vm554_vm1, %v1895_v24, %v442_v20  ;;  %v578_v39 = vsel %vm554_vm1, %v1900_v26, %v426_v32  ;;  %v2065_v26 = vld [vmem:[%s2225_s2] ss:$0 sm:$0xff] }
 0x13b   : > { %v479_v33 = vpop.permute.xlu1 %478  ;;  %v463_v34 = vpop.permute.xlu0 %462 }
 0x13c   : > { %v635_v40 = vsel %vm603_vm4, %v602_v37, %v479_v33  ;;  %v619_v43 = vsel %vm603_vm4, %v578_v39, %v463_v34 }
 0x13f   : > { %v516_v35 = vpop.permute.xlu1 %515  ;;  %v500_v36 = vpop.permute.xlu0 %499 }
 0x140   : > { %v683_v6 = vsel %vm636_vm5, %v635_v40, %v516_v35  ;;  %v659_v24 = vsel %vm636_vm5, %v619_v43, %v500_v36 }
 0x143   : > { %v553_v38 = vpop.permute.xlu1 %552  ;;  %v537_v42 = vpop.permute.xlu0 %536 }
 0x144   : > { %v717_v41 = vsel %vm685_vm2, %v516_v35, %v553_v38  ;;  %v701_v5 = vsel %vm685_vm2, %v500_v36, %v537_v42 }
 0x145   : > { %1347 = vmatprep.mubr.msk.bf16.mxu1 %vm825_vm3, %v717_v41  ;;  %1339 = vmatprep.mubr.msk.bf16.mxu0 %vm825_vm3, %v701_v5 }
 0x146   : > { %1015 = vmatmul.mubr.bf16.gmra.mrb[28].mxu1 %v683_v6  ;;  %951 = vmatmul.mubr.bf16.gmra.mrb[28].mxu0 %v659_v24 }
 0x1a9   : > { %v960_v45 = vpop.f32.mrb[0].mxu1  ;;  %v896_v46 = vpop.f32.mrb[0].mxu0 }
 0x1aa   : > { %v961_v47 = vadd.f32 %v2065_v26, %v960_v45  ;;  %v962_v48 = vpop.f32.mrb[1].mxu1  ;;  %v897_v49 = vadd.f32 %v2065_v26, %v896_v46  ;;  %v898_v50 = vpop.f32.mrb[1].mxu0 }
 0x1ab   : > { %v963_v51 = vpop.f32.mrb[2].mxu1  ;;  %v899_v53 = vpop.f32.mrb[2].mxu0 }
 0x1ac   : > { %vm1039_vm7 = vcmp.ge.f32.partialorder %v961_v47, 0.0  ;;  %v1078_v52 = vmul.f32 %v2070_v44, %v961_v47  ;;  %v964_v54 = vadd.f32 %v2065_v26, %v963_v51  ;;  %v965_v55 = vpop.f32.mrb[3].mxu1  ;;  %vm1023_vm8 = vcmp.ge.f32.partialorder %v897_v49, 0.0  ;;  %v901_v7 = vpop.f32.mrb[3].mxu0 }
 0x1ad   : > { %v1062_v56 = vmul.f32 %v2070_v44, %v897_v49  ;;  %v900_v57 = vadd.f32 %v2065_v26, %v899_v53 }
 0x1ae   : > { %v1110_v8 = vsel %vm1039_vm7, %v961_v47, %v1078_v52  ;;  %vm1040_vm9 = vcmp.ge.f32.partialorder %v964_v54, 0.0  ;;  %v1079_v58 = vmul.f32 %v2070_v44, %v964_v54 }
 0x1af   : > { %v1094_v59 = vsel %vm1023_vm8, %v897_v49, %v1062_v56  ;;  %1143 = vst.msk [vmem:[%s2077_s25 + $0x80] sm:$0xff] %vm1126_vm6, %v1110_v8  ;;  %vm1024_vm10 = vcmp.ge.f32.partialorder %v900_v57, 0.0  ;;  %v1063_v60 = vmul.f32 %v2070_v44, %v900_v57 }
 0x1b0   : > { %1127 = vst.msk [vmem:[%s2077_s25] sm:$0xff] %vm1126_vm6, %v1094_v59  ;;  %v1111_v61 = vsel %vm1040_vm9, %v964_v54, %v1079_v58 }
 0x1b1   : > { %v1095_v62 = vsel %vm1024_vm10, %v900_v57, %v1063_v60  ;;  %1144 = vst.msk [vmem:[%s2077_s25 + $0x88] sm:$0xff] %vm1126_vm6, %v1111_v61 }
 0x1b2   : > { %1128 = vst.msk [vmem:[%s2077_s25 + $0x8] sm:$0xff] %vm1126_vm6, %v1095_v62 }
 0x1b9   : > { %v968_v63 = vpop.f32.mrb[4].mxu1  ;;  %v904_v0 = vpop.f32.mrb[4].mxu0 }
 0x1ba   : > { %v969_v9 = vadd.f32 %v2065_v26, %v968_v63  ;;  %v970_v4 = vpop.f32.mrb[5].mxu1  ;;  %v905_v2 = vadd.f32 %v2065_v26, %v904_v0  ;;  %v906_v10 = vpop.f32.mrb[5].mxu0 }
 0x1bb   : > { %v971_v11 = vpop.f32.mrb[6].mxu1  ;;  %v907_v15 = vpop.f32.mrb[6].mxu0 }
 0x1bc   : > { %vm1041_vm11 = vcmp.ge.f32.partialorder %v969_v9, 0.0  ;;  %v1080_v13 = vmul.f32 %v2070_v44, %v969_v9  ;;  %v972_v12 = vadd.f32 %v2065_v26, %v971_v11  ;;  %v973_v14 = vpop.f32.mrb[7].mxu1  ;;  %vm1025_vm12 = vcmp.ge.f32.partialorder %v905_v2, 0.0  ;;  %v909_v19 = vpop.f32.mrb[7].mxu0 }
 0x1bd   : > { %v1064_v16 = vmul.f32 %v2070_v44, %v905_v2  ;;  %v908_v17 = vadd.f32 %v2065_v26, %v907_v15 }
 0x1be   : > { %v1112_v21 = vsel %vm1041_vm11, %v969_v9, %v1080_v13  ;;  %vm1042_vm13 = vcmp.ge.f32.partialorder %v972_v12, 0.0  ;;  %v1081_v22 = vmul.f32 %v2070_v44, %v972_v12 }
 0x1bf   : > { %v1096_v23 = vsel %vm1025_vm12, %v905_v2, %v1064_v16  ;;  %1145 = vst.msk [vmem:[%s2077_s25 + $0x90] sm:$0xff] %vm1126_vm6, %v1112_v21  ;;  %vm1026_vm14 = vcmp.ge.f32.partialorder %v908_v17, 0.0  ;;  %v1065_v25 = vmul.f32 %v2070_v44, %v908_v17 }
 0x1c0   : > { %1129 = vst.msk [vmem:[%s2077_s25 + $0x10] sm:$0xff] %vm1126_vm6, %v1096_v23  ;;  %v1113_v27 = vsel %vm1042_vm13, %v972_v12, %v1081_v22 }
 0x1c1   : > { %v1097_v28 = vsel %vm1026_vm14, %v908_v17, %v1065_v25  ;;  %1146 = vst.msk [vmem:[%s2077_s25 + $0x98] sm:$0xff] %vm1126_vm6, %v1113_v27 }
 0x1c2   : > { %1130 = vst.msk [vmem:[%s2077_s25 + $0x18] sm:$0xff] %vm1126_vm6, %v1097_v28 }
 0x1c9   : > { %v976_v29 = vpop.f32.mrb[8].mxu1  ;;  %v912_v3 = vpop.f32.mrb[8].mxu0 }
 0x1ca   : > { %v977_v1 = vadd.f32 %v2065_v26, %v976_v29  ;;  %v978_v30 = vpop.f32.mrb[9].mxu1  ;;  %v913_v31 = vadd.f32 %v2065_v26, %v912_v3  ;;  %v914_v18 = vpop.f32.mrb[9].mxu0 }
 0x1cb   : > { %v979_v20 = vpop.f32.mrb[10].mxu1  ;;  %v915_v33 = vpop.f32.mrb[10].mxu0 }
 0x1cc   : > { %vm1043_vm15 = vcmp.ge.f32.partialorder %v977_v1, 0.0  ;;  %v1082_v32 = vmul.f32 %v2070_v44, %v977_v1  ;;  %v980_v34 = vadd.f32 %v2065_v26, %v979_v20  ;;  %v981_v35 = vpop.f32.mrb[11].mxu1  ;;  %vm1027_vm0 = vcmp.ge.f32.partialorder %v913_v31, 0.0  ;;  %v917_v38 = vpop.f32.mrb[11].mxu0 }
 0x1cd   : > { %v1066_v36 = vmul.f32 %v2070_v44, %v913_v31  ;;  %v916_v37 = vadd.f32 %v2065_v26, %v915_v33 }
 0x1ce   : > { %v1114_v39 = vsel %vm1043_vm15, %v977_v1, %v1082_v32  ;;  %vm1044_vm1 = vcmp.ge.f32.partialorder %v980_v34, 0.0  ;;  %v1083_v40 = vmul.f32 %v2070_v44, %v980_v34 }
 0x1cf   : > { %v1098_v41 = vsel %vm1027_vm0, %v913_v31, %v1066_v36  ;;  %1147 = vst.msk [vmem:[%s2077_s25 + $0xa0] sm:$0xff] %vm1126_vm6, %v1114_v39  ;;  %vm1028_vm2 = vcmp.ge.f32.partialorder %v916_v37, 0.0  ;;  %v1067_v42 = vmul.f32 %v2070_v44, %v916_v37 }
 0x1d0   : > { %1131 = vst.msk [vmem:[%s2077_s25 + $0x20] sm:$0xff] %vm1126_vm6, %v1098_v41  ;;  %v1115_v43 = vsel %vm1044_vm1, %v980_v34, %v1083_v40 }
 0x1d1   : > { %v1099_v5 = vsel %vm1028_vm2, %v916_v37, %v1067_v42  ;;  %1148 = vst.msk [vmem:[%s2077_s25 + $0xa8] sm:$0xff] %vm1126_vm6, %v1115_v43 }
 0x1d2   : > { %1132 = vst.msk [vmem:[%s2077_s25 + $0x28] sm:$0xff] %vm1126_vm6, %v1099_v5 }
 0x1d9   : > { %v984_v6 = vpop.f32.mrb[12].mxu1  ;;  %v920_v24 = vpop.f32.mrb[12].mxu0 }
 0x1da   : > { %v985_v45 = vadd.f32 %v2065_v26, %v984_v6  ;;  %v986_v46 = vpop.f32.mrb[13].mxu1  ;;  %v921_v47 = vadd.f32 %v2065_v26, %v920_v24  ;;  %v922_v48 = vpop.f32.mrb[13].mxu0 }
 0x1db   : > { %v987_v49 = vpop.f32.mrb[14].mxu1  ;;  %v923_v51 = vpop.f32.mrb[14].mxu0 }
 0x1dc   : > { %vm1045_vm3 = vcmp.ge.f32.partialorder %v985_v45, 0.0  ;;  %v1084_v50 = vmul.f32 %v2070_v44, %v985_v45  ;;  %v988_v52 = vadd.f32 %v2065_v26, %v987_v49  ;;  %v989_v53 = vpop.f32.mrb[15].mxu1  ;;  %vm1029_vm4 = vcmp.ge.f32.partialorder %v921_v47, 0.0  ;;  %v925_v56 = vpop.f32.mrb[15].mxu0 }
 0x1dd   : > { %v1068_v54 = vmul.f32 %v2070_v44, %v921_v47  ;;  %v924_v55 = vadd.f32 %v2065_v26, %v923_v51 }
 0x1de   : > { %v1116_v57 = vsel %vm1045_vm3, %v985_v45, %v1084_v50  ;;  %vm1046_vm5 = vcmp.ge.f32.partialorder %v988_v52, 0.0  ;;  %v1085_v7 = vmul.f32 %v2070_v44, %v988_v52 }
 0x1df   : > { %v1100_v8 = vsel %vm1029_vm4, %v921_v47, %v1068_v54  ;;  %1149 = vst.msk [vmem:[%s2077_s25 + $0xb0] sm:$0xff] %vm1126_vm6, %v1116_v57  ;;  %vm1030_vm7 = vcmp.ge.f32.partialorder %v924_v55, 0.0  ;;  %v1069_v58 = vmul.f32 %v2070_v44, %v924_v55 }
 0x1e0   : > { %1133 = vst.msk [vmem:[%s2077_s25 + $0x30] sm:$0xff] %vm1126_vm6, %v1100_v8  ;;  %v1117_v59 = vsel %vm1046_vm5, %v988_v52, %v1085_v7 }
 0x1e1   : > { %v1101_v60 = vsel %vm1030_vm7, %v924_v55, %v1069_v58  ;;  %1150 = vst.msk [vmem:[%s2077_s25 + $0xb8] sm:$0xff] %vm1126_vm6, %v1117_v59 }
 0x1e2   : > { %1134 = vst.msk [vmem:[%s2077_s25 + $0x38] sm:$0xff] %vm1126_vm6, %v1101_v60 }
 0x1e9   : > { %v992_v61 = vpop.f32.mrb[16].mxu1  ;;  %v928_v62 = vpop.f32.mrb[16].mxu0 }
 0x1ea   : > { %v993_v63 = vadd.f32 %v2065_v26, %v992_v61  ;;  %v994_v0 = vpop.f32.mrb[17].mxu1  ;;  %v929_v9 = vadd.f32 %v2065_v26, %v928_v62  ;;  %v930_v4 = vpop.f32.mrb[17].mxu0 }
 0x1eb   : > { %v995_v2 = vpop.f32.mrb[18].mxu1  ;;  %v931_v11 = vpop.f32.mrb[18].mxu0 }
 0x1ec   : > { %vm1047_vm8 = vcmp.ge.f32.partialorder %v993_v63, 0.0  ;;  %v1086_v10 = vmul.f32 %v2070_v44, %v993_v63  ;;  %v996_v13 = vadd.f32 %v2065_v26, %v995_v2  ;;  %v997_v15 = vpop.f32.mrb[19].mxu1  ;;  %vm1031_vm9 = vcmp.ge.f32.partialorder %v929_v9, 0.0  ;;  %v933_v16 = vpop.f32.mrb[19].mxu0 }
 0x1ed   : > { %v1070_v12 = vmul.f32 %v2070_v44, %v929_v9  ;;  %v932_v14 = vadd.f32 %v2065_v26, %v931_v11 }
 0x1ee   : > { %v1118_v17 = vsel %vm1047_vm8, %v993_v63, %v1086_v10  ;;  %vm1048_vm10 = vcmp.ge.f32.partialorder %v996_v13, 0.0  ;;  %v1087_v19 = vmul.f32 %v2070_v44, %v996_v13 }
 0x1ef   : > { %v1102_v21 = vsel %vm1031_vm9, %v929_v9, %v1070_v12  ;;  %1151 = vst.msk [vmem:[%s2077_s25 + $0xc0] sm:$0xff] %vm1126_vm6, %v1118_v17  ;;  %vm1032_vm11 = vcmp.ge.f32.partialorder %v932_v14, 0.0  ;;  %v1071_v22 = vmul.f32 %v2070_v44, %v932_v14 }
 0x1f0   : > { %1135 = vst.msk [vmem:[%s2077_s25 + $0x40] sm:$0xff] %vm1126_vm6, %v1102_v21  ;;  %v1119_v23 = vsel %vm1048_vm10, %v996_v13, %v1087_v19 }
 0x1f1   : > { %v1103_v25 = vsel %vm1032_vm11, %v932_v14, %v1071_v22  ;;  %1152 = vst.msk [vmem:[%s2077_s25 + $0xc8] sm:$0xff] %vm1126_vm6, %v1119_v23 }
 0x1f2   : > { %1136 = vst.msk [vmem:[%s2077_s25 + $0x48] sm:$0xff] %vm1126_vm6, %v1103_v25 }
 0x1f9   : > { %v1000_v27 = vpop.f32.mrb[20].mxu1  ;;  %v936_v28 = vpop.f32.mrb[20].mxu0 }
 0x1fa   : > { %v1001_v29 = vadd.f32 %v2065_v26, %v1000_v27  ;;  %v1002_v3 = vpop.f32.mrb[21].mxu1  ;;  %v937_v1 = vadd.f32 %v2065_v26, %v936_v28  ;;  %v938_v30 = vpop.f32.mrb[21].mxu0 }
 0x1fb   : > { %v1003_v31 = vpop.f32.mrb[22].mxu1  ;;  %v939_v20 = vpop.f32.mrb[22].mxu0 }
 0x1fc   : > { %vm1049_vm12 = vcmp.ge.f32.partialorder %v1001_v29, 0.0  ;;  %v1088_v18 = vmul.f32 %v2070_v44, %v1001_v29  ;;  %v1004_v32 = vadd.f32 %v2065_v26, %v1003_v31  ;;  %v1005_v33 = vpop.f32.mrb[23].mxu1  ;;  %vm1033_vm13 = vcmp.ge.f32.partialorder %v937_v1, 0.0  ;;  %v941_v36 = vpop.f32.mrb[23].mxu0 }
 0x1fd   : > { %v1072_v34 = vmul.f32 %v2070_v44, %v937_v1  ;;  %v940_v35 = vadd.f32 %v2065_v26, %v939_v20 }
 0x1fe   : > { %v1120_v37 = vsel %vm1049_vm12, %v1001_v29, %v1088_v18  ;;  %vm1050_vm14 = vcmp.ge.f32.partialorder %v1004_v32, 0.0  ;;  %v1089_v38 = vmul.f32 %v2070_v44, %v1004_v32 }
 0x1ff   : > { %v1104_v39 = vsel %vm1033_vm13, %v937_v1, %v1072_v34  ;;  %1153 = vst.msk [vmem:[%s2077_s25 + $0xd0] sm:$0xff] %vm1126_vm6, %v1120_v37  ;;  %vm1034_vm15 = vcmp.ge.f32.partialorder %v940_v35, 0.0  ;;  %v1073_v40 = vmul.f32 %v2070_v44, %v940_v35 }
 0x200   : > { %1137 = vst.msk [vmem:[%s2077_s25 + $0x50] sm:$0xff] %vm1126_vm6, %v1104_v39  ;;  %v1121_v41 = vsel %vm1050_vm14, %v1004_v32, %v1089_v38 }
 0x201   : > { %v1105_v42 = vsel %vm1034_vm15, %v940_v35, %v1073_v40  ;;  %1154 = vst.msk [vmem:[%s2077_s25 + $0xd8] sm:$0xff] %vm1126_vm6, %v1121_v41 }
 0x202   : > { %1138 = vst.msk [vmem:[%s2077_s25 + $0x58] sm:$0xff] %vm1126_vm6, %v1105_v42 }
 0x209   : > { %v1008_v43 = vpop.f32.mrb[24].mxu1  ;;  %v944_v5 = vpop.f32.mrb[24].mxu0 }
 0x20a   : > { %v1009_v6 = vadd.f32 %v2065_v26, %v1008_v43  ;;  %v1010_v24 = vpop.f32.mrb[25].mxu1  ;;  %v945_v45 = vadd.f32 %v2065_v26, %v944_v5  ;;  %v946_v46 = vpop.f32.mrb[25].mxu0 }
 0x20b   : > { %v1011_v47 = vpop.f32.mrb[26].mxu1  ;;  %v947_v49 = vpop.f32.mrb[26].mxu0 }
 0x20c   : > { %vm1051_vm0 = vcmp.ge.f32.partialorder %v1009_v6, 0.0  ;;  %v1090_v48 = vmul.f32 %v2070_v44, %v1009_v6  ;;  %v1012_v50 = vadd.f32 %v2065_v26, %v1011_v47  ;;  %v1013_v51 = vpop.f32.mrb[27].mxu1  ;;  %vm1035_vm1 = vcmp.ge.f32.partialorder %v945_v45, 0.0  ;;  %v949_v54 = vpop.f32.mrb[27].mxu0 }
 0x20d   : > { %v1074_v52 = vmul.f32 %v2070_v44, %v945_v45  ;;  %v948_v53 = vadd.f32 %v2065_v26, %v947_v49 }
 0x20e   : > { %v1122_v55 = vsel %vm1051_vm0, %v1009_v6, %v1090_v48  ;;  %vm1052_vm2 = vcmp.ge.f32.partialorder %v1012_v50, 0.0  ;;  %v1091_v56 = vmul.f32 %v2070_v44, %v1012_v50 }
 0x20f   : > { %v1106_v57 = vsel %vm1035_vm1, %v945_v45, %v1074_v52  ;;  %1155 = vst.msk [vmem:[%s2077_s25 + $0xe0] sm:$0xff] %vm1126_vm6, %v1122_v55  ;;  %vm1036_vm3 = vcmp.ge.f32.partialorder %v948_v53, 0.0  ;;  %v1075_v7 = vmul.f32 %v2070_v44, %v948_v53 }
 0x210   : > { %1139 = vst.msk [vmem:[%s2077_s25 + $0x60] sm:$0xff] %vm1126_vm6, %v1106_v57  ;;  %v1123_v8 = vsel %vm1052_vm2, %v1012_v50, %v1091_v56 }
 0x211   : > { %v1107_v58 = vsel %vm1036_vm3, %v948_v53, %v1075_v7  ;;  %1156 = vst.msk [vmem:[%s2077_s25 + $0xe8] sm:$0xff] %vm1126_vm6, %v1123_v8 }
 0x212   : > { %1140 = vst.msk [vmem:[%s2077_s25 + $0x68] sm:$0xff] %vm1126_vm6, %v1107_v58 }
 0x219   : > { %v1016_v59 = vpop.f32.mrb[28].mxu1  ;;  %v952_v60 = vpop.f32.mrb[28].mxu0 }
 0x21a   : > { %v1017_v61 = vadd.f32 %v2065_v26, %v1016_v59  ;;  %v1018_v62 = vpop.f32.mrb[29].mxu1  ;;  %v953_v63 = vadd.f32 %v2065_v26, %v952_v60  ;;  %v954_v0 = vpop.f32.mrb[29].mxu0 }
 0x21b   : > { %v1019_v9 = vpop.f32.mrb[30].mxu1  ;;  %v955_v2 = vpop.f32.mrb[30].mxu0 }
 0x21c   : > { %vm1053_vm4 = vcmp.ge.f32.partialorder %v1017_v61, 0.0  ;;  %v1092_v4 = vmul.f32 %v2070_v44, %v1017_v61  ;;  %v1020_v10 = vadd.f32 %v2065_v26, %v1019_v9  ;;  %v1021_v11 = vpop.f32.mrb[31].mxu1  ;;  %vm1037_vm5 = vcmp.ge.f32.partialorder %v953_v63, 0.0  ;;  %v957_v12 = vpop.f32.mrb[31].mxu0 }
 0x21d   : > { %v1076_v13 = vmul.f32 %v2070_v44, %v953_v63  ;;  %v956_v15 = vadd.f32 %v2065_v26, %v955_v2 }
 0x21e   : > { %v1124_v14 = vsel %vm1053_vm4, %v1017_v61, %v1092_v4  ;;  %vm1054_vm7 = vcmp.ge.f32.partialorder %v1020_v10, 0.0  ;;  %v1093_v16 = vmul.f32 %v2070_v44, %v1020_v10 }
 0x21f   : > { %v1108_v17 = vsel %vm1037_vm5, %v953_v63, %v1076_v13  ;;  %1157 = vst.msk [vmem:[%s2077_s25 + $0xf0] sm:$0xff] %vm1126_vm6, %v1124_v14  ;;  %vm1038_vm8 = vcmp.ge.f32.partialorder %v956_v15, 0.0  ;;  %v1077_v19 = vmul.f32 %v2070_v44, %v956_v15 }
 0x220   : > { %1141 = vst.msk [vmem:[%s2077_s25 + $0x70] sm:$0xff] %vm1126_vm6, %v1108_v17  ;;  %v1125_v21 = vsel %vm1054_vm7, %v1020_v10, %v1093_v16 }
 0x221   : > { %v1109_v22 = vsel %vm1038_vm8, %v956_v15, %v1077_v19  ;;  %1158 = vst.msk [vmem:[%s2077_s25 + $0xf8] sm:$0xff] %vm1126_vm6, %v1125_v21 }
 0x222   : > { %1142 = vst.msk [vmem:[%s2077_s25 + $0x78] sm:$0xff] %vm1126_vm6, %v1109_v22 }
 0x223 PF: > { %s18_s20 = sadd.s32 1, %s1599_s20   ;;  %s2240_s15 = smov %s1583_s16 }
 0x224   : > { %p15_p1 = scmp.ge.s32.totalorder %s18_s20, 4   ;;  %s2241_s16 = smov %s1587_s17 }
 0x225   : > { %s2242_s17 = smov %s1724_s26  ;;  %s2243_s18 = smov %s1595_s19 }
 0x226   : > { %s2244_s19 = smov %s2246_s28  ;;  %17 = sbr.rel (!%p15_p1) target bundleno = 5 (0x5), region = 80 }
 0x22d   :  { %1200 = vsyncpa [#allocation3], 1 }
 0x22e   :  { %1202 = vsyncpa [#allocation3 + $0x1], 1 }
 0x22f   :  { %1203 = vsyncpa [#allocation5], 1 }

</bundles_post_ra>
